<compile_context>
chip_gen: v7x
topology: tpu7x:2x2x1
jax: 0.10.0
libtpu: 0.0.40
codegen_flags: <defaults>
</compile_context>

<pallas_src>
import jax
import jax.numpy as jnp
from jax.experimental import pallas as pl
from jax.experimental.pallas import tpu as pltpu


_LN_EPS = 1e-5
_SQRT_2_OVER_PI = 0.7978845608028654


def _gelu(x):
    # TODO(synk): PyTorch nn.GELU() defaults to the exact erf-based GELU; the tanh
    # approximation is used here (erf has no reliable Mosaic lowering).
    return 0.5 * x * (1.0 + jnp.tanh(_SQRT_2_OVER_PI * (x + 0.044715 * x * x * x)))


def _kernel(x_ref, k_ref, vo_ref, wq_ref, w1_ref, w2_ref, bias_ref, out_ref):
    """Fused transformer block on one (E, block_rows) feature-major tile."""
    f32 = jnp.float32
    ie = x_ref[0].astype(f32)            # (E, rows)   image tokens, feature-major
    k = k_ref[0].astype(f32)             # (T, E)      folded key projection
    vo = vo_ref[0].astype(f32)           # (E, T)      folded value @ out_proj
    bias = bias_ref[...].astype(f32)     # (E, 8)      packed per-feature columns
    ln1g, ln1b, bq, bo, ln2g, ln2b, b1, b2 = [bias[:, i:i + 1] for i in range(8)]

    # LayerNorm 1 (feature axis = axis 0)
    mu = jnp.mean(ie, axis=0, keepdims=True)
    var = jnp.mean(jnp.square(ie - mu), axis=0, keepdims=True)
    nie = (ie - mu) * jax.lax.rsqrt(var + _LN_EPS) * ln1g + ln1b

    # Folded q projection: to_q -> MHA in-proj -> 1/sqrt(E) scale, one matmul.
    q = jnp.dot(wq_ref[...], nie, preferred_element_type=f32) + bq       # (E, rows)

    # TODO(synk): assumes num_heads == 1 (the module default); num_heads > 1 would
    # need a per-head split of q/k/v and per-head softmax.
    s = jnp.dot(k, q, preferred_element_type=f32)                        # (T, rows)
    m = jnp.max(s, axis=0, keepdims=True)
    e = jnp.exp(s - m)
    p = e * pl.reciprocal(jnp.sum(e, axis=0, keepdims=True), approx=True)
    attn = jnp.dot(vo, p, preferred_element_type=f32) + bo               # (E, rows)

    out1 = attn + ie

    # LayerNorm 2 + GELU-MLP + residual
    mu2 = jnp.mean(out1, axis=0, keepdims=True)
    var2 = jnp.mean(jnp.square(out1 - mu2), axis=0, keepdims=True)
    h = (out1 - mu2) * jax.lax.rsqrt(var2 + _LN_EPS) * ln2g + ln2b
    h = _gelu(h)
    h = jnp.dot(w1_ref[...], h, preferred_element_type=f32) + b1
    h = _gelu(h)
    h = jnp.dot(w2_ref[...], h, preferred_element_type=f32) + b2
    out_ref[0] = (h + out1).astype(out_ref.dtype)


def _pick_block_rows(S, B, target=512):
    """Largest divisor of S that is a multiple of 128 and <= target.

    When B == 1 the target is shrunk so the (B, n_row_blocks) grid has >= 2
    'parallel' steps (keeps both TensorCores busy on v7x / megacore). Falls back
    to the full S when no 128-multiple divisor exists (full-extent block is
    always legal)."""
    if B < 2 and S >= 256:
        target = min(target, S // 2)
    best = None
    d = 128
    while d <= min(S, target):
        if S % d == 0:
            best = d
        d += 128
    return best if best is not None else S


def cross_attention(image_embeds, text_embeds, params, *, block_rows=None):
    """image_embeds: (B, C_in, H, W); text_embeds: (B, T, text_dim).

    params uses PyTorch conventions: Linear weights are (out, in), 1x1 Conv2d
    weights are (out, in, 1, 1), MHA in_proj is packed (3E, E) / (3E,)."""
    B, C_in, Hh, Ww = image_embeds.shape
    _, T, Dt = text_embeds.shape
    S = Hh * Ww
    use_conv = "to_input_w" in params
    E = params["to_q_w"].shape[0]
    if not use_conv:
        assert C_in == E, "in_channels must equal embed_dim when no conv projections"
    dtype = image_embeds.dtype
    f32 = jnp.float32
    hi = jax.lax.Precision.HIGHEST

    # ---------- host-side algebraic weight folds (tiny GEMMs, f32/HIGHEST) ----------
    wqi, wki, wvi = jnp.split(params["in_proj_w"].astype(f32), 3, axis=0)
    bqi, bki, bvi = jnp.split(params["in_proj_b"].astype(f32), 3, axis=0)
    wo = params["out_proj_w"].astype(f32)
    scale = float(E) ** -0.5

    wq_eff = scale * jnp.dot(wqi, params["to_q_w"].astype(f32), precision=hi)   # (E, E)
    bq_eff = scale * bqi                                                          # (E,)
    wk_comb = jnp.dot(wki, params["to_k_w"].astype(f32), precision=hi)            # (E, Dt)
    wvo = jnp.dot(wo, jnp.dot(wvi, params["to_v_w"].astype(f32), precision=hi),
                  precision=hi)                                                   # (E, Dt)
    bvo = jnp.dot(wo, bvi, precision=hi)                                          # (E,)

    # Per-batch text-side projections (image-tile invariant; done once, not per block).
    txt = text_embeds.astype(f32)
    k_eff = jnp.einsum("btd,ed->bte", txt, wk_comb, precision=hi) + bki[None, None, :]   # (B,T,E)
    voT = jnp.einsum("ed,btd->bet", wvo, txt, precision=hi) + bvo[None, :, None]          # (B,E,T)

    # Packed per-feature columns: [ln1_g, ln1_b, bq_eff, bo, ln2_g, ln2_b, b1, b2].
    bias_pack = jnp.stack(
        [params["ln1_g"], params["ln1_b"], bq_eff, params["out_proj_b"],
         params["ln2_g"], params["ln2_b"], params["ff1_b"], params["ff2_b"]],
        axis=1).astype(f32)                                                       # (E, 8)

    w1 = params["ff1_w"].astype(f32)   # (E, E) torch (out,in): applied as W @ x
    w2 = params["ff2_w"].astype(f32)

    # ---------- NCHW-flattened activations (no transposes, kernel is feature-major) ----------
    x = image_embeds.reshape(B, C_in, S)
    if use_conv:
        wci = params["to_input_w"][:, :, 0, 0].astype(f32)                        # (E, C_in)
        x = (jnp.einsum("oi,bis->bos", wci, x.astype(f32), precision=hi)
             + params["to_input_b"].astype(f32)[None, :, None])                   # (B, E, S)

    if block_rows is None or S % block_rows != 0 or (block_rows % 128 != 0 and block_rows != S):
        block_rows = _pick_block_rows(S, B)
    n_row_blocks = S // block_rows

    inputs = [x, k_eff, voT, wq_eff, w1, w2, bias_pack]

    # NOTE: constant-index weight blocks are DMA'd once by the pipeline (block index
    # never changes); pl.Buffered(1) could additionally drop their second VMEM buffer
    # at production sizes (left at the default here for lowering safety).
    def const2d(arr):
        return pl.BlockSpec(arr.shape, lambda b, r: (0, 0))

    x_spec = pl.BlockSpec((1, E, block_rows), lambda b, r: (b, 0, r))
    k_spec = pl.BlockSpec((1, T, E), lambda b, r: (b, 0, 0))
    vo_spec = pl.BlockSpec((1, E, T), lambda b, r: (b, 0, 0))
    out_spec = pl.BlockSpec((1, E, block_rows), lambda b, r: (b, 0, r))
    in_specs = [x_spec, k_spec, vo_spec,
                const2d(wq_eff), const2d(w1), const2d(w2), const2d(bias_pack)]

    tokens = B * S
    cost = pl.CostEstimate(
        flops=2 * tokens * (3 * E * E + 2 * E * T),
        transcendentals=tokens * (2 * E + T + 2),
        bytes_accessed=4 * (2 * tokens * E + 2 * B * T * E + 3 * E * E + 8 * E),
    )

    out_flat = pl.pallas_call(
        _kernel,
        out_shape=jax.ShapeDtypeStruct((B, E, S), dtype),
        grid_spec=pltpu.PrefetchScalarGridSpec(
            num_scalar_prefetch=0,
            grid=(B, n_row_blocks),
            in_specs=in_specs,
            out_specs=out_spec,
        ),
        compiler_params=pltpu.CompilerParams(
            dimension_semantics=("parallel", "parallel"),
            vmem_limit_bytes=64 * 1024 * 1024,
        ),
        cost_estimate=cost,
    )(*inputs)

    if use_conv:
        wco = params["to_output_w"][:, :, 0, 0].astype(f32)                       # (C_in, E)
        y = (jnp.einsum("oe,bes->bos", wco, out_flat.astype(f32), precision=hi)
             + params["to_output_b"].astype(f32)[None, :, None])
        return y.astype(dtype).reshape(B, C_in, Hh, Ww)
    return out_flat.reshape(B, E, Hh, Ww)


# ----------------------------- pure-JAX reference -----------------------------

def _layernorm_ref(x, g, b):
    mu = jnp.mean(x, axis=-1, keepdims=True)
    var = jnp.mean(jnp.square(x - mu), axis=-1, keepdims=True)
    return (x - mu) * jax.lax.rsqrt(var + _LN_EPS) * g + b


def cross_attention_reference(image_embeds, text_embeds, params):
    use_conv = "to_input_w" in params
    x = image_embeds
    if use_conv:
        w = params["to_input_w"][:, :, 0, 0]
        x = jnp.einsum("oi,bihw->bohw", w, x) + params["to_input_b"][None, :, None, None]
    B, C, H, W = x.shape
    ie = jnp.transpose(x, (0, 2, 3, 1)).reshape(B, H * W, C)
    nie = _layernorm_ref(ie, params["ln1_g"], params["ln1_b"])
    q = nie @ params["to_q_w"].T
    k = text_embeds @ params["to_k_w"].T
    v = text_embeds @ params["to_v_w"].T
    wqi, wki, wvi = jnp.split(params["in_proj_w"], 3, axis=0)
    bqi, bki, bvi = jnp.split(params["in_proj_b"], 3, axis=0)
    q = q @ wqi.T + bqi
    k = k @ wki.T + bki
    v = v @ wvi.T + bvi
    scores = jnp.einsum("bse,bte->bst", q, k) * (C ** -0.5)
    p = jax.nn.softmax(scores, axis=-1)
    ctx = jnp.einsum("bst,bte->bse", p, v)
    attn_out = ctx @ params["out_proj_w"].T + params["out_proj_b"]
    out1 = attn_out + ie
    h = _layernorm_ref(out1, params["ln2_g"], params["ln2_b"])
    h = _gelu(h)
    h = h @ params["ff1_w"].T + params["ff1_b"]
    h = _gelu(h)
    h = h @ params["ff2_w"].T + params["ff2_b"]
    out = h + out1
    out = jnp.transpose(out.reshape(B, H, W, C), (0, 3, 1, 2))
    if use_conv:
        w = params["to_output_w"][:, :, 0, 0]
        out = jnp.einsum("oi,bihw->bohw", w, out) + params["to_output_b"][None, :, None, None]
    return out


if __name__ == "__main__":
    root = jax.random.PRNGKey(0)
    ks = jax.random.split(root, 24)

    B, H, W = 2, 16, 16
    E = 32           # embed_dim (== in_channels on the default, no-conv path)
    T, Dt = 8, 32    # text sequence length, text_dim

    def nrm(k, shape, scale=0.1):
        return scale * jax.random.normal(k, shape, dtype=jnp.float32)

    params = dict(
        ln1_g=1.0 + nrm(ks[0], (E,)), ln1_b=nrm(ks[1], (E,)),
        ln2_g=1.0 + nrm(ks[2], (E,)), ln2_b=nrm(ks[3], (E,)),
        to_q_w=nrm(ks[4], (E, E)),
        to_k_w=nrm(ks[5], (E, Dt)),
        to_v_w=nrm(ks[6], (E, Dt)),
        in_proj_w=nrm(ks[7], (3 * E, E)),
        in_proj_b=nrm(ks[8], (3 * E,)),
        out_proj_w=nrm(ks[9], (E, E)),
        out_proj_b=nrm(ks[10], (E,)),
        ff1_w=nrm(ks[11], (E, E)), ff1_b=nrm(ks[12], (E,)),
        ff2_w=nrm(ks[13], (E, E)), ff2_b=nrm(ks[14], (E,)),
    )

    text = jax.random.normal(ks[16], (B, T, Dt), dtype=jnp.float32)

    # Tolerance has a little headroom for the EUP approx-reciprocal softmax
    # denominator and the host-side (f32/HIGHEST) weight folds.
    ATOL = RTOL = 1e-3

    # ---- Path 1: embed_dim == in_channels (default ctor, use_conv=False) ----
    image = jax.random.normal(ks[15], (B, E, H, W), dtype=jnp.float32)
    out = jax.block_until_ready(cross_attention(image, text, params))
    with jax.default_matmul_precision("highest"):
        ref = jax.block_until_ready(cross_attention_reference(image, text, params))
    assert out.shape == (B, E, H, W)
    assert jnp.allclose(out, ref, atol=ATOL, rtol=RTOL), float(jnp.max(jnp.abs(out - ref)))

    # ---- Path 2: in_channels != embed_dim (use_conv=True, 1x1 conv in/out) ----
    C_in = 4
    params_conv = dict(params)
    params_conv.update(
        to_input_w=nrm(ks[17], (E, C_in, 1, 1)), to_input_b=nrm(ks[18], (E,)),
        to_output_w=nrm(ks[19], (C_in, E, 1, 1)), to_output_b=nrm(ks[20], (C_in,)),
    )
    image2 = jax.random.normal(ks[21], (B, C_in, H, W), dtype=jnp.float32)
    out2 = jax.block_until_ready(cross_attention(image2, text, params_conv))
    with jax.default_matmul_precision("highest"):
        ref2 = jax.block_until_ready(cross_attention_reference(image2, text, params_conv))
    assert out2.shape == (B, C_in, H, W)
    assert jnp.allclose(out2, ref2, atol=ATOL, rtol=RTOL), float(jnp.max(jnp.abs(out2 - ref2)))

    print("KERNEL_OK")
</pallas_src>

<mosaic_0001>
module attributes {stable_mosaic.version = 11 : i64} {
  func.func @_kernel(%arg0: i32, %arg1: i32, %arg2: memref<1x32x256xf32, #tpu.memory_space<vmem>>, %arg3: memref<1x8x32xf32, #tpu.memory_space<vmem>>, %arg4: memref<1x32x8xf32, #tpu.memory_space<vmem>>, %arg5: memref<32x32xf32, #tpu.memory_space<vmem>>, %arg6: memref<32x32xf32, #tpu.memory_space<vmem>>, %arg7: memref<32x32xf32, #tpu.memory_space<vmem>>, %arg8: memref<32x8xf32, #tpu.memory_space<vmem>>, %arg9: memref<1x32x256xf32, #tpu.memory_space<vmem>>) attributes {dimension_semantics = [#tpu.dimension_semantics<parallel>, #tpu.dimension_semantics<parallel>], iteration_bounds = array<i64: 2, 1>, scalar_prefetch = 0 : i64, scratch_operands = 0 : i64, tpu.core_type = #tpu.core_type<tc>, window_params = [{transform_indices = @transform_0, window_bounds = array<i64: 1, 32, 256>}, {transform_indices = @transform_1, window_bounds = array<i64: 1, 8, 32>}, {transform_indices = @transform_2, window_bounds = array<i64: 1, 32, 8>}, {pipeline_mode = #tpu.pipeline_mode<synchronous>, transform_indices = @transform_3, window_bounds = array<i64: 32, 32>}, {pipeline_mode = #tpu.pipeline_mode<synchronous>, transform_indices = @transform_4, window_bounds = array<i64: 32, 32>}, {pipeline_mode = #tpu.pipeline_mode<synchronous>, transform_indices = @transform_5, window_bounds = array<i64: 32, 32>}, {pipeline_mode = #tpu.pipeline_mode<synchronous>, transform_indices = @transform_6, window_bounds = array<i64: 32, 8>}, {transform_indices = @transform_7, window_bounds = array<i64: 1, 32, 256>}]} {
    %c0 = arith.constant 0 : index
    %c0_0 = arith.constant 0 : index
    %c0_1 = arith.constant 0 : index
    %0 = vector.load %arg2[%c0, %c0_0, %c0_1] : memref<1x32x256xf32, #tpu.memory_space<vmem>>, vector<1x32x256xf32>
    %1 = vector.shape_cast %0 : vector<1x32x256xf32> to vector<32x256xf32>
    %c0_2 = arith.constant 0 : index
    %c0_3 = arith.constant 0 : index
    %c0_4 = arith.constant 0 : index
    %2 = vector.load %arg3[%c0_2, %c0_3, %c0_4] : memref<1x8x32xf32, #tpu.memory_space<vmem>>, vector<1x8x32xf32>
    %3 = vector.shape_cast %2 : vector<1x8x32xf32> to vector<8x32xf32>
    %c0_5 = arith.constant 0 : index
    %c0_6 = arith.constant 0 : index
    %c0_7 = arith.constant 0 : index
    %4 = vector.load %arg4[%c0_5, %c0_6, %c0_7] : memref<1x32x8xf32, #tpu.memory_space<vmem>>, vector<1x32x8xf32>
    %5 = vector.shape_cast %4 : vector<1x32x8xf32> to vector<32x8xf32>
    %c0_8 = arith.constant 0 : index
    %c0_9 = arith.constant 0 : index
    %6 = vector.load %arg8[%c0_8, %c0_9] : memref<32x8xf32, #tpu.memory_space<vmem>>, vector<32x8xf32>
    %7 = vector.extract_strided_slice %6 {offsets = [0, 0], sizes = [32, 1], strides = [1, 1]} : vector<32x8xf32> to vector<32x1xf32>
    %8 = vector.extract_strided_slice %6 {offsets = [0, 1], sizes = [32, 1], strides = [1, 1]} : vector<32x8xf32> to vector<32x1xf32>
    %9 = vector.extract_strided_slice %6 {offsets = [0, 2], sizes = [32, 1], strides = [1, 1]} : vector<32x8xf32> to vector<32x1xf32>
    %10 = vector.extract_strided_slice %6 {offsets = [0, 3], sizes = [32, 1], strides = [1, 1]} : vector<32x8xf32> to vector<32x1xf32>
    %11 = vector.extract_strided_slice %6 {offsets = [0, 4], sizes = [32, 1], strides = [1, 1]} : vector<32x8xf32> to vector<32x1xf32>
    %12 = vector.extract_strided_slice %6 {offsets = [0, 5], sizes = [32, 1], strides = [1, 1]} : vector<32x8xf32> to vector<32x1xf32>
    %13 = vector.extract_strided_slice %6 {offsets = [0, 6], sizes = [32, 1], strides = [1, 1]} : vector<32x8xf32> to vector<32x1xf32>
    %14 = vector.extract_strided_slice %6 {offsets = [0, 7], sizes = [32, 1], strides = [1, 1]} : vector<32x8xf32> to vector<32x1xf32>
    %cst = arith.constant dense<0.000000e+00> : vector<256xf32>
    %15 = vector.multi_reduction <add>, %1, %cst [0] : vector<32x256xf32> to vector<256xf32>
    %16 = vector.shape_cast %15 : vector<256xf32> to vector<1x256xf32>
    %cst_10 = arith.constant 3.200000e+01 : f32
    %17 = vector.broadcast %cst_10 : f32 to vector<1x256xf32>
    %18 = arith.divf %16, %17 : vector<1x256xf32>
    %19 = vector.broadcast %18 : vector<1x256xf32> to vector<32x256xf32>
    %20 = arith.subf %1, %19 : vector<32x256xf32>
    %21 = arith.mulf %20, %20 : vector<32x256xf32>
    %cst_11 = arith.constant dense<0.000000e+00> : vector<256xf32>
    %22 = vector.multi_reduction <add>, %21, %cst_11 [0] : vector<32x256xf32> to vector<256xf32>
    %23 = vector.shape_cast %22 : vector<256xf32> to vector<1x256xf32>
    %cst_12 = arith.constant 3.200000e+01 : f32
    %24 = vector.broadcast %cst_12 : f32 to vector<1x256xf32>
    %25 = arith.divf %23, %24 : vector<1x256xf32>
    %26 = vector.broadcast %18 : vector<1x256xf32> to vector<32x256xf32>
    %27 = arith.subf %1, %26 : vector<32x256xf32>
    %cst_13 = arith.constant 9.99999974E-6 : f32
    %28 = vector.broadcast %cst_13 : f32 to vector<1x256xf32>
    %29 = arith.addf %25, %28 : vector<1x256xf32>
    %30 = math.rsqrt %29 : vector<1x256xf32>
    %31 = vector.broadcast %30 : vector<1x256xf32> to vector<32x256xf32>
    %32 = arith.mulf %27, %31 : vector<32x256xf32>
    %33 = vector.broadcast %7 : vector<32x1xf32> to vector<32x256xf32>
    %34 = arith.mulf %32, %33 : vector<32x256xf32>
    %35 = vector.broadcast %8 : vector<32x1xf32> to vector<32x256xf32>
    %36 = arith.addf %34, %35 : vector<32x256xf32>
    %c0_14 = arith.constant 0 : index
    %c0_15 = arith.constant 0 : index
    %37 = vector.load %arg5[%c0_14, %c0_15] : memref<32x32xf32, #tpu.memory_space<vmem>>, vector<32x32xf32>
    %cst_16 = arith.constant dense<0.000000e+00> : vector<32x256xf32>
    %38 = tpu.matmul %37, %36, %cst_16 {dimension_numbers = #tpu.dot_dimension_numbers<[1], [0], [0], [1], [0, 0, 1, 1], [], []>} : vector<32x32xf32>, vector<32x256xf32>, vector<32x256xf32> -> vector<32x256xf32>
    %39 = vector.broadcast %9 : vector<32x1xf32> to vector<32x256xf32>
    %40 = arith.addf %38, %39 : vector<32x256xf32>
    %cst_17 = arith.constant dense<0.000000e+00> : vector<8x256xf32>
    %41 = tpu.matmul %3, %40, %cst_17 {dimension_numbers = #tpu.dot_dimension_numbers<[1], [0], [0], [1], [0, 0, 1, 1], [], []>} : vector<8x32xf32>, vector<32x256xf32>, vector<8x256xf32> -> vector<8x256xf32>
    %cst_18 = arith.constant dense<0xFF800000> : vector<256xf32>
    %42 = vector.multi_reduction <maximumf>, %41, %cst_18 [0] : vector<8x256xf32> to vector<256xf32>
    %43 = vector.shape_cast %42 : vector<256xf32> to vector<1x256xf32>
    %44 = vector.broadcast %43 : vector<1x256xf32> to vector<8x256xf32>
    %45 = arith.subf %41, %44 : vector<8x256xf32>
    %46 = math.exp %45 : vector<8x256xf32>
    %cst_19 = arith.constant dense<0.000000e+00> : vector<256xf32>
    %47 = vector.multi_reduction <add>, %46, %cst_19 [0] : vector<8x256xf32> to vector<256xf32>
    %48 = vector.shape_cast %47 : vector<256xf32> to vector<1x256xf32>
    %49 = tpu.reciprocal %48 {approx = true} : vector<1x256xf32> -> vector<1x256xf32>
    %50 = vector.broadcast %49 : vector<1x256xf32> to vector<8x256xf32>
    %51 = arith.mulf %46, %50 : vector<8x256xf32>
    %cst_20 = arith.constant dense<0.000000e+00> : vector<32x256xf32>
    %52 = tpu.matmul %5, %51, %cst_20 {dimension_numbers = #tpu.dot_dimension_numbers<[1], [0], [0], [1], [0, 0, 1, 1], [], []>} : vector<32x8xf32>, vector<8x256xf32>, vector<32x256xf32> -> vector<32x256xf32>
    %53 = vector.broadcast %10 : vector<32x1xf32> to vector<32x256xf32>
    %54 = arith.addf %52, %53 : vector<32x256xf32>
    %55 = arith.addf %54, %1 : vector<32x256xf32>
    %cst_21 = arith.constant dense<0.000000e+00> : vector<256xf32>
    %56 = vector.multi_reduction <add>, %55, %cst_21 [0] : vector<32x256xf32> to vector<256xf32>
    %57 = vector.shape_cast %56 : vector<256xf32> to vector<1x256xf32>
    %cst_22 = arith.constant 3.200000e+01 : f32
    %58 = vector.broadcast %cst_22 : f32 to vector<1x256xf32>
    %59 = arith.divf %57, %58 : vector<1x256xf32>
    %60 = vector.broadcast %59 : vector<1x256xf32> to vector<32x256xf32>
    %61 = arith.subf %55, %60 : vector<32x256xf32>
    %62 = arith.mulf %61, %61 : vector<32x256xf32>
    %cst_23 = arith.constant dense<0.000000e+00> : vector<256xf32>
    %63 = vector.multi_reduction <add>, %62, %cst_23 [0] : vector<32x256xf32> to vector<256xf32>
    %64 = vector.shape_cast %63 : vector<256xf32> to vector<1x256xf32>
    %cst_24 = arith.constant 3.200000e+01 : f32
    %65 = vector.broadcast %cst_24 : f32 to vector<1x256xf32>
    %66 = arith.divf %64, %65 : vector<1x256xf32>
    %67 = vector.broadcast %59 : vector<1x256xf32> to vector<32x256xf32>
    %68 = arith.subf %55, %67 : vector<32x256xf32>
    %cst_25 = arith.constant 9.99999974E-6 : f32
    %69 = vector.broadcast %cst_25 : f32 to vector<1x256xf32>
    %70 = arith.addf %66, %69 : vector<1x256xf32>
    %71 = math.rsqrt %70 : vector<1x256xf32>
    %72 = vector.broadcast %71 : vector<1x256xf32> to vector<32x256xf32>
    %73 = arith.mulf %68, %72 : vector<32x256xf32>
    %74 = vector.broadcast %11 : vector<32x1xf32> to vector<32x256xf32>
    %75 = arith.mulf %73, %74 : vector<32x256xf32>
    %76 = vector.broadcast %12 : vector<32x1xf32> to vector<32x256xf32>
    %77 = arith.addf %75, %76 : vector<32x256xf32>
    %cst_26 = arith.constant 5.000000e-01 : f32
    %78 = vector.broadcast %cst_26 : f32 to vector<32x256xf32>
    %79 = arith.mulf %78, %77 : vector<32x256xf32>
    %cst_27 = arith.constant 4.471500e-02 : f32
    %80 = vector.broadcast %cst_27 : f32 to vector<32x256xf32>
    %81 = arith.mulf %80, %77 : vector<32x256xf32>
    %82 = arith.mulf %81, %77 : vector<32x256xf32>
    %83 = arith.mulf %82, %77 : vector<32x256xf32>
    %84 = arith.addf %77, %83 : vector<32x256xf32>
    %cst_28 = arith.constant 0.797884583 : f32
    %85 = vector.broadcast %cst_28 : f32 to vector<32x256xf32>
    %86 = arith.mulf %85, %84 : vector<32x256xf32>
    %87 = math.tanh %86 : vector<32x256xf32>
    %cst_29 = arith.constant 1.000000e+00 : f32
    %88 = vector.broadcast %cst_29 : f32 to vector<32x256xf32>
    %89 = arith.addf %88, %87 : vector<32x256xf32>
    %90 = arith.mulf %79, %89 : vector<32x256xf32>
    %c0_30 = arith.constant 0 : index
    %c0_31 = arith.constant 0 : index
    %91 = vector.load %arg6[%c0_30, %c0_31] : memref<32x32xf32, #tpu.memory_space<vmem>>, vector<32x32xf32>
    %cst_32 = arith.constant dense<0.000000e+00> : vector<32x256xf32>
    %92 = tpu.matmul %91, %90, %cst_32 {dimension_numbers = #tpu.dot_dimension_numbers<[1], [0], [0], [1], [0, 0, 1, 1], [], []>} : vector<32x32xf32>, vector<32x256xf32>, vector<32x256xf32> -> vector<32x256xf32>
    %93 = vector.broadcast %13 : vector<32x1xf32> to vector<32x256xf32>
    %94 = arith.addf %92, %93 : vector<32x256xf32>
    %cst_33 = arith.constant 5.000000e-01 : f32
    %95 = vector.broadcast %cst_33 : f32 to vector<32x256xf32>
    %96 = arith.mulf %95, %94 : vector<32x256xf32>
    %cst_34 = arith.constant 4.471500e-02 : f32
    %97 = vector.broadcast %cst_34 : f32 to vector<32x256xf32>
    %98 = arith.mulf %97, %94 : vector<32x256xf32>
    %99 = arith.mulf %98, %94 : vector<32x256xf32>
    %100 = arith.mulf %99, %94 : vector<32x256xf32>
    %101 = arith.addf %94, %100 : vector<32x256xf32>
    %cst_35 = arith.constant 0.797884583 : f32
    %102 = vector.broadcast %cst_35 : f32 to vector<32x256xf32>
    %103 = arith.mulf %102, %101 : vector<32x256xf32>
    %104 = math.tanh %103 : vector<32x256xf32>
    %cst_36 = arith.constant 1.000000e+00 : f32
    %105 = vector.broadcast %cst_36 : f32 to vector<32x256xf32>
    %106 = arith.addf %105, %104 : vector<32x256xf32>
    %107 = arith.mulf %96, %106 : vector<32x256xf32>
    %c0_37 = arith.constant 0 : index
    %c0_38 = arith.constant 0 : index
    %108 = vector.load %arg7[%c0_37, %c0_38] : memref<32x32xf32, #tpu.memory_space<vmem>>, vector<32x32xf32>
    %cst_39 = arith.constant dense<0.000000e+00> : vector<32x256xf32>
    %109 = tpu.matmul %108, %107, %cst_39 {dimension_numbers = #tpu.dot_dimension_numbers<[1], [0], [0], [1], [0, 0, 1, 1], [], []>} : vector<32x32xf32>, vector<32x256xf32>, vector<32x256xf32> -> vector<32x256xf32>
    %110 = vector.broadcast %14 : vector<32x1xf32> to vector<32x256xf32>
    %111 = arith.addf %109, %110 : vector<32x256xf32>
    %112 = arith.addf %111, %55 : vector<32x256xf32>
    %c0_40 = arith.constant 0 : index
    %c0_41 = arith.constant 0 : index
    %c0_42 = arith.constant 0 : index
    %113 = vector.load %arg9[%c0_40, %c0_41, %c0_42] : memref<1x32x256xf32, #tpu.memory_space<vmem>>, vector<1x32x256xf32>
    %114 = vector.shape_cast %113 : vector<1x32x256xf32> to vector<32x256xf32>
    %115 = vector.shape_cast %112 : vector<32x256xf32> to vector<1x32x256xf32>
    tpu.vector_store %arg9[%c0_40, %c0_41, %c0_42], %115 {strides = array<i32>} : memref<1x32x256xf32, #tpu.memory_space<vmem>>, vector<1x32x256xf32>,
    return
  }
  func.func @transform_0(%arg0: i32, %arg1: i32) -> (i32, i32, i32) {
    %c0_i32 = arith.constant 0 : i32
    %c0_i32_0 = arith.constant 0 : i32
    return %arg0, %c0_i32, %arg1 : i32, i32, i32
  }
  func.func @transform_1(%arg0: i32, %arg1: i32) -> (i32, i32, i32) {
    %c0_i32 = arith.constant 0 : i32
    %c0_i32_0 = arith.constant 0 : i32
    %c0_i32_1 = arith.constant 0 : i32
    return %arg0, %c0_i32, %c0_i32_0 : i32, i32, i32
  }
  func.func @transform_2(%arg0: i32, %arg1: i32) -> (i32, i32, i32) {
    %c0_i32 = arith.constant 0 : i32
    %c0_i32_0 = arith.constant 0 : i32
    %c0_i32_1 = arith.constant 0 : i32
    return %arg0, %c0_i32, %c0_i32_0 : i32, i32, i32
  }
  func.func @transform_3(%arg0: i32, %arg1: i32) -> (i32, i32) {
    %c0_i32 = arith.constant 0 : i32
    %c0_i32_0 = arith.constant 0 : i32
    %c0_i32_1 = arith.constant 0 : i32
    return %c0_i32, %c0_i32_0 : i32, i32
  }
  func.func @transform_4(%arg0: i32, %arg1: i32) -> (i32, i32) {
    %c0_i32 = arith.constant 0 : i32
    %c0_i32_0 = arith.constant 0 : i32
    %c0_i32_1 = arith.constant 0 : i32
    return %c0_i32, %c0_i32_0 : i32, i32
  }
  func.func @transform_5(%arg0: i32, %arg1: i32) -> (i32, i32) {
    %c0_i32 = arith.constant 0 : i32
    %c0_i32_0 = arith.constant 0 : i32
    %c0_i32_1 = arith.constant 0 : i32
    return %c0_i32, %c0_i32_0 : i32, i32
  }
  func.func @transform_6(%arg0: i32, %arg1: i32) -> (i32, i32) {
    %c0_i32 = arith.constant 0 : i32
    %c0_i32_0 = arith.constant 0 : i32
    %c0_i32_1 = arith.constant 0 : i32
    return %c0_i32, %c0_i32_0 : i32, i32
  }
  func.func @transform_7(%arg0: i32, %arg1: i32) -> (i32, i32, i32) {
    %c0_i32 = arith.constant 0 : i32
    %c0_i32_0 = arith.constant 0 : i32
    return %arg0, %c0_i32, %arg1 : i32, i32, i32
  }
}

</mosaic_0001>

<bundles_post_ra>
// kernel: tpu_custom_call.1
= control target key start
LH: loop header
LB: loop body
LE: loop exit
PB: predicated region body
PF: predicated region fallthrough
CT: control target
= control target key end

     0   :  { %s2931_s0 = inlined_call_operand.hbm [shape: f32[2,32,256], index: 0, kind: input, shape index: {}]   ;;  %s2932_s1 = inlined_call_operand.hbm [shape: f32[2,8,32], index: 1, kind: input, shape index: {}]   ;;  %s2933_s2 = inlined_call_operand.hbm [shape: f32[2,32,8], index: 2, kind: input, shape index: {}]   ;;  %s2934_s3 = inlined_call_operand.hbm [shape: f32[32,32], index: 3, kind: input, shape index: {}]   ;;  %s2935_s4 = inlined_call_operand.hbm [shape: f32[32,32], index: 4, kind: input, shape index: {}]   ;;  %s2936_s5 = inlined_call_operand.hbm [shape: f32[32,32], index: 5, kind: input, shape index: {}]   ;;  %s2937_s6 = inlined_call_operand.hbm [shape: f32[32,8], index: 6, kind: input, shape index: {}]   ;;  %s2938_s7 = inlined_call_operand.hbm [shape: f32[2,32,256], index: 7, kind: output, shape index: {}]  }
   0x1   :  { %2959 = sst [smem:[#allocation26_spill]] %s2932_s1 }
   0x2   :  { %2960 = sst [smem:[#allocation27_spill]] %s2934_s3 }
   0x3   :  { %2961 = sst [smem:[#allocation28_spill]] %s2936_s5 }
   0x4   :  { %12 = vsyncpa [#allocation3], 0 }
   0x5   :  { %14 = vsyncpa [#allocation3 + $0x1], 0 }
   0x6   :  { %15 = vsyncpa [#allocation6], 0 }
   0x7   :  { %17 = vsyncpa [#allocation6 + $0x1], 0 }
   0x8   :  { %18 = vsyncpa [#allocation9], 0 }
   0x9   :  { %19 = vsyncpa [#allocation12], 0 }
   0xa   :  { %20 = vsyncpa [#allocation4], 0 }
   0xb   :  { %22 = vsyncpa [#allocation4 + $0x1], 0  ;;  %s2283_s24 = smov 0   ;;  %s2285_s25 = smov 0  }
   0xc   :  { %s2287_s26 = smov 0   ;;  %s2289_s27 = smov 0  }
   0xd   :  { %s2291_s28 = smov 0   ;;  %s2293_s29 = smov 0  }
   0xe LB: > { %2962 = sst [smem:[#allocation20_spill]] %s2198_s24  ;;  %s2314_s30 = sadd.s32 4294967295, %s2218_s29   ;;  %s2218_s29 = sphi %s2293_s29, %s28_s29   ;;  %s2214_s28 = sphi %s2291_s28, %s3004_s28   ;;  %s2210_s27 = sphi %s2289_s27, %s3003_s27   ;;  %s2206_s26 = sphi %s2287_s26, %s2999_s26   ;;  %s2202_s25 = sphi %s2285_s25, %s3002_s25   ;;  %s2198_s24 = sphi %s2283_s24, %s3001_s24  }
   0xf   : > { %2963 = sst [smem:[#allocation21_spill]] %s2206_s26  ;;  %p1647_p0 = scmp.ge.s32.totalorder %s2218_s29, 1 }
  0x10   : > { %2964 = sst [smem:[#allocation22_spill]] %s2218_s29  ;;  %p2939_p1 = scmp.eq.s32.totalorder %s2314_s30, 0 }
  0x11   : > { %p237_p2 = scmp.lt.s32.totalorder %s2218_s29, 3  ;;  %s2220_s9 = smov [#allocation8]  }
  0x12   : > { %s249_s10 = sshll.u32 %s2220_s9, 4  ;;  %s2221_s12 = smov [#allocation11]   ;;  %s2323_s10 = int_to_ptr.vmem [resolvable:$true] %s249_s10 }
  0x13   : > { %p2319_p3 = pnand %p1647_p0, %p237_p2  ;;  %s275_s13 = sshll.u32 %s2221_s12, 4  ;;  %s2334_s13 = int_to_ptr.vmem [resolvable:$true] %s275_s13 }
  0x14   : > { %s2967_s3 = sld [smem:[#allocation27_spill]] }
  0x15   : > { %s2965_s8 = scalar_select %p2319_p3, 1, 0 }
  0x16   : > { %p1751_p4 = pneg %p2319_p3 }
  0x18   : > { %p2330_p6 = pnand %p1751_p4, %p2939_p1 }
  0x1a   : > { %s2966_s11 = scalar_select %p2330_p6, 1, 0 }
  0x1b   : > { %s1922_s16 = scalar_lea.hbm %s2967_s3, 512  ;;  %p2344_p8 = pneg %p2330_p6 }
  0x1c   : > { %p1923_p7 = scmp.ne.s32.totalorder %s2967_s3, %s1922_s16  ;;  %p1929_p11 = scmp.lt.u32.totalorder %s1922_s16, %s2967_s3 }
  0x1d   : > { %s2968_s19 = scalar_select %p2344_p8, 1, 0 }
  0x1e   : > { %p1925_p9 = pnand %p2344_p8, %p1923_p7 }
  0x20   : > { %p1926_p10 = pneg %p1925_p9 }
  0x22   : > { %p1931_p12 = pnand %p1929_p11, %p1926_p10 }
  0x24   : > { %1934 = shalt.err (!%p1931_p12)
}
  0x25   : > { %s1935_s22 = scalar_lea.vmem %s2323_s10, 512  ;;  %p1943_p4 = scmp.lt.s32.totalorder %s2323_s10, %s2323_s10 }
  0x26   : > { %p1936_p13 = scmp.ne.s32.totalorder %s2323_s10, %s1935_s22  ;;  %p1944_p5 = scmp.lt.s32.totalorder %s1935_s22, %s1935_s22 }
  0x28   : > { %p1938_p0 = pnand %p1936_p13, %p2344_p8  ;;  %p1945_p7 = por %p1944_p5, %p1943_p4 }
  0x2a   : > { %p1939_p2 = pneg %p1938_p0 }
  0x2c   : > { %p1946_p9 = pnand %p1945_p7, %p1939_p2 }
  0x2e   : > { %1949 = shalt.err (!%p1946_p9)
}
  0x2f   : > { %s2940_s23 = smov 128   ;;  %s2942_s9 = smov 8  }
  0x30   : > { %1754 = dma.hbm_to_vmem [thread:$0]  (!%p2330_p6), %s2967_s3, 512, %s2323_s10, [#allocation9], %s2940_s23, %s2940_s23, %s2942_s9  }
  0x31   : > { %s2969_s5 = sld [smem:[#allocation28_spill]] }
  0x37   : > { %s1950_s17 = scalar_lea.hbm %s2969_s5, 512 }
  0x38   : > { %p1951_p5 = scmp.ne.s32.totalorder %s2969_s5, %s1950_s17  ;;  %p1957_p12 = scmp.lt.u32.totalorder %s1950_s17, %s2969_s5 }
  0x3a   : > { %p1953_p10 = pnand %p1951_p5, %p2344_p8 }
  0x3c   : > { %p1954_p11 = pneg %p1953_p10 }
  0x3e   : > { %p1959_p13 = pnand %p1957_p12, %p1954_p11 }
  0x40   : > { %1962 = shalt.err (!%p1959_p13)
}
  0x41   : > { %s1963_s10 = scalar_lea.vmem %s2334_s13, 512  ;;  %p1971_p7 = scmp.lt.s32.totalorder %s2334_s13, %s2334_s13 }
  0x42   : > { %p1964_p0 = scmp.ne.s32.totalorder %s2334_s13, %s1963_s10  ;;  %p1972_p9 = scmp.lt.s32.totalorder %s1963_s10, %s1963_s10 }
  0x44   : > { %p1966_p2 = pnand %p1964_p0, %p2344_p8  ;;  %p1973_p5 = por %p1972_p9, %p1971_p7 }
  0x46   : > { %p1967_p4 = pneg %p1966_p2 }
  0x48   : > { %p1974_p10 = pnand %p1973_p5, %p1967_p4 }
  0x4a   : > { %1977 = shalt.err (!%p1974_p10)
}
  0x4b   : > { %1760 = dma.hbm_to_vmem [thread:$0]  (!%p2330_p6), %s2969_s5, 512, %s2334_s13, [#allocation12], %s2940_s23, %s2940_s23, %s2942_s9  }
  0x4c   : > { %s1646_s15 = sadd.s32 4294967294, %s2218_s29   ;;  %s40_s16 = sadd.s32 1, %s2214_s28 }
  0x4d   : > { %p42_p11 = scmp.ge.s32.totalorder %s40_s16, 2  ;;  %s49_s17 = sadd.s32 1, %s2206_s26 }
  0x4e   : > { %p56_p12 = scmp.ne.s32.totalorder %s2206_s26, %s2202_s25  ;;  %p57_p13 = scmp.eq.s32.totalorder %s2218_s29, 0 }
  0x4f   : > { %s3006_s16 = smov (%p42_p11, %s40_s16), 0  ;;  %p62_p2 = scmp.ne.s32.totalorder %s2202_s25, %s2198_s24 }
  0x50   : > { %2970 = sst [smem:[#allocation23_spill]] %s3006_s16  ;;  %p2402_p0 = por %p57_p13, %p56_p12 }
  0x51   : > { %s44_s13 = ssub.s32 %s2214_s28, %s3006_s16  ;;  %p224_p4 = scmp.eq.s32.totalorder %s2314_s30, 1 }
  0x52   : > { %p47_p7 = scmp.eq.s32.totalorder %s44_s13, 0  ;;  %p2413_p9 = por %p2939_p1, %p62_p2 }
  0x53   : > { %p2417_p5 = por %p224_p4, %p56_p12  ;;  %p230_p10 = scmp.eq.s32.totalorder %s1646_s15, 1 }
  0x54   : > { %s2972_s20 = scalar_select %p2413_p9, 1, 0 }
  0x55   : > { %s2973_s21 = scalar_select %p2417_p5, 1, 0 }
  0x56   : > { %s2422_s22 = scalar_select %p47_p7, %s2206_s26, %s49_s17  }
  0x57   : > { %p2424_p11 = por %p230_p10, %p62_p2  ;;  %p1782_p13 = scmp.lt.s32.totalorder %s2218_s29, 2 }
  0x58   : > { %2974 = sst [smem:[#allocation24_spill]] %s2422_s22  ;;  %s2430_s12 = sand.u32 1, %s2206_s26  }
  0x59   : > { %s2975_s10 = scalar_select %p2424_p11, 1, 0 }
  0x5a   : > { %s325_s14 = sand.u32 1, %s2218_s29   ;;  %p2435_p1 = pnand %p1782_p13, %p2402_p0 }
  0x5b   : > { %2976 = sst [smem:[#allocation25_spill]] %s2975_s10  ;;  %s1656_s23 = sshll.u32 %s2430_s12, 3 }
  0x5c   : > { %s2977_s13 = scalar_select %p2435_p1, 1, 0 }
  0x5d   : > { %s1657_s15 = sshll.u32 %s2214_s28, 7  ;;  %s2978_s1 = sld [smem:[#allocation26_spill]] }
  0x5e   : > { %s329_s5 = scalar_lea.vmem [#allocation5], %s1656_s23  ;;  %s2449_s22 = scalar_lea.sflag [#allocation6], %s325_s14 }
  0x5f   : > { %s336_s16 = sshll.u32 %s329_s5, 4  ;;  %p2455_p0 = pneg %p2435_p1  ;;  %s2446_s16 = int_to_ptr.vmem [resolvable:$true] %s336_s16 }
  0x63   : > { %s2444_s3 = scalar_lea.hbm %s2978_s1, %s1657_s15  ;;  %s1983_s5 = scalar_lea.hbm %s2978_s1, 256 }
  0x64   : > { %s1978_s26 = scalar_lea.hbm %s2444_s3, 128  ;;  %p1984_p7 = scmp.lt.u32.totalorder %s2444_s3, %s2978_s1 }
  0x65   : > { %p1979_p12 = scmp.ne.s32.totalorder %s2444_s3, %s1978_s26  ;;  %p1985_p10 = scmp.lt.u32.totalorder %s1983_s5, %s1978_s26 }
  0x66   : > { %p1987_p11 = scmp.lt.u32.totalorder %s1978_s26, %s2444_s3 }
  0x67   : > { %p1981_p2 = pnand %p2455_p0, %p1979_p12  ;;  %p1986_p13 = por %p1985_p10, %p1984_p7 }
  0x69   : > { %p1982_p4 = pneg %p1981_p2  ;;  %p1988_p5 = por %p1987_p11, %p1986_p13 }
  0x6b   : > { %p1989_p9 = pnand %p1988_p5, %p1982_p4 }
  0x6d   : > { %1992 = shalt.err (!%p1989_p9)
}
  0x6e   : > { %s1993_s14 = scalar_lea.vmem %s2446_s16, 128  ;;  %s2224_s9 = smov [#allocation5]  }
  0x6f   : > { %p1994_p12 = scmp.ne.s32.totalorder %s2446_s16, %s1993_s14  ;;  %s1998_s15 = sshll.u32 %s2224_s9, 4  ;;  %s1999_s15 = int_to_ptr.vmem [resolvable:$false] %s1998_s15 }
  0x70   : > { %s2000_s23 = scalar_lea.vmem %s1999_s15, 256  ;;  %p2001_p6 = scmp.lt.s32.totalorder %s2446_s16, %s1999_s15 }
  0x71   : > { %p1996_p2 = pnand %p1994_p12, %p2455_p0  ;;  %p2002_p8 = scmp.lt.s32.totalorder %s2000_s23, %s1993_s14 }
  0x73   : > { %p1997_p3 = pneg %p1996_p2  ;;  %p2003_p7 = por %p2002_p8, %p2001_p6 }
  0x75   : > { %p2004_p10 = pnand %p2003_p7, %p1997_p3 }
  0x77   : > { %2007 = shalt.err (!%p2004_p10)
}
  0x78   : > { %1770 = dma.hbm_to_vmem [thread:$0]  (!%p2435_p1), %s2444_s3, 128, %s2446_s16, %s2449_s22  }
  0x79   : > { %s2225_s26 = smov [#allocation10]   ;;  %s2226_s17 = smov [#allocation13]  }
  0x7a   : > { %s262_s5 = sshll.u32 %s2225_s26, 4  ;;  %s288_s18 = sshll.u32 %s2226_s17, 4  ;;  %s263_s5 = int_to_ptr.vmem [resolvable:$true] %s262_s5  ;;  %s2479_s18 = int_to_ptr.vmem [resolvable:$true] %s288_s18 }
  0x7b   : > { %s2008_s14 = scalar_lea.hbm %s2935_s4, 512  ;;  %p2980_p6 = scmp.ne.s32.totalorder %s2968_s19, 0 }
  0x7c   : > { %p2009_p3 = scmp.ne.s32.totalorder %s2935_s4, %s2008_s14  ;;  %p2015_p5 = scmp.lt.u32.totalorder %s2008_s14, %s2935_s4 }
  0x7e   : > { %p2011_p8 = pnand %p2009_p3, %p2980_p6 }
  0x80   : > { %p2012_p9 = pneg %p2011_p8 }
  0x82   : > { %p2017_p11 = pnand %p2015_p5, %p2012_p9 }
  0x84   : > { %2020 = shalt.err (!%p2017_p11)
}
  0x85   : > { %s2021_s16 = scalar_lea.vmem %s263_s5, 512  ;;  %p2029_p2 = scmp.lt.s32.totalorder %s263_s5, %s263_s5 }
  0x86   : > { %p2022_p4 = scmp.ne.s32.totalorder %s263_s5, %s2021_s16  ;;  %p2030_p7 = scmp.lt.s32.totalorder %s2021_s16, %s2021_s16 }
  0x88   : > { %p2024_p13 = pnand %p2022_p4, %p2980_p6  ;;  %p2031_p10 = por %p2030_p7, %p2029_p2 }
  0x8a   : > { %p2025_p12 = pneg %p2024_p13 }
  0x8c   : > { %p2032_p1 = pnand %p2031_p10, %p2025_p12 }
  0x8e   : > { %2035 = shalt.err (!%p2032_p1)
}
  0x8f   : > { %p2981_p3 = scmp.ne.s32.totalorder %s2966_s11, 0  ;;  %s2982_s1 = smov 8  }
  0x90   : > { %s2983_s26 = smov 128   ;;  %s2036_s14 = scalar_lea.hbm %s2937_s6, 512 }
  0x91   : > { %1757 = dma.hbm_to_vmem [thread:$0]  (!%p2981_p3), %s2935_s4, 512, %s263_s5, [#allocation9], %s2983_s26, %s2983_s26, %s2982_s1  }
  0x92   : > { %p2037_p8 = scmp.ne.s32.totalorder %s2937_s6, %s2036_s14  ;;  %p2043_p5 = scmp.lt.u32.totalorder %s2036_s14, %s2937_s6 }
  0x94   : > { %p2039_p1 = pnand %p2037_p8, %p2980_p6 }
  0x96   : > { %p2040_p9 = pneg %p2039_p1 }
  0x98   : > { %p2045_p11 = pnand %p2043_p5, %p2040_p9 }
  0x9a   : > { %2048 = shalt.err (!%p2045_p11)
}
  0x9b   : > { %s2049_s5 = scalar_lea.vmem %s2479_s18, 512  ;;  %p2057_p2 = scmp.lt.s32.totalorder %s2479_s18, %s2479_s18 }
  0x9c   : > { %p2050_p4 = scmp.ne.s32.totalorder %s2479_s18, %s2049_s5  ;;  %p2058_p7 = scmp.lt.s32.totalorder %s2049_s5, %s2049_s5 }
  0x9e   : > { %p2052_p13 = pnand %p2050_p4, %p2980_p6  ;;  %p2059_p10 = por %p2058_p7, %p2057_p2 }
  0xa0   : > { %p2053_p12 = pneg %p2052_p13 }
  0xa2   : > { %p2060_p8 = pnand %p2059_p10, %p2053_p12 }
  0xa4   : > { %2063 = shalt.err (!%p2060_p8)
}
  0xa5   : > { %1763 = dma.hbm_to_vmem [thread:$0]  (!%p2981_p3), %s2937_s6, 512, %s2479_s18, [#allocation12], %s2983_s26, %s2983_s26, %s2982_s1  }
  0xa6   : > { %s1653_s19 = sshll.u32 %s2430_s12, 6  ;;  %s1692_s17 = sshll.u32 %s2214_s28, 10 }
  0xa7   : > { %s2533_s14 = scalar_lea.hbm %s2931_s0, %s1692_s17  ;;  %s306_s11 = scalar_lea.vmem [#allocation2], %s1653_s19 }
  0xa8   : > { %s315_s23 = sshll.u32 %s306_s11, 4  ;;  %s303_s3 = scalar_lea.sflag [#allocation3], %s2430_s12  ;;  %s2535_s23 = int_to_ptr.vmem [resolvable:$true] %s315_s23 }
  0xa9   : > { %s2064_s16 = scalar_lea.hbm %s2533_s14, 1024  ;;  %s2069_s24 = scalar_lea.hbm %s2931_s0, 2048 }
  0xaa   : > { %p2065_p6 = scmp.ne.s32.totalorder %s2533_s14, %s2064_s16  ;;  %p2070_p9 = scmp.lt.u32.totalorder %s2533_s14, %s2931_s0 }
  0xab   : > { %p2071_p5 = scmp.lt.u32.totalorder %s2069_s24, %s2064_s16  ;;  %p2073_p4 = scmp.lt.u32.totalorder %s2064_s16, %s2533_s14 }
  0xac   : > { %p2067_p3 = pnand %p2065_p6, %p2455_p0 }
  0xad   : > { %p2072_p11 = por %p2071_p5, %p2070_p9 }
  0xae   : > { %p2068_p1 = pneg %p2067_p3 }
  0xaf   : > { %p2074_p13 = por %p2073_p4, %p2072_p11 }
  0xb1   : > { %p2075_p12 = pnand %p2074_p13, %p2068_p1 }
  0xb3   : > { %2078 = shalt.err (!%p2075_p12)
}
  0xb4   : > { %s2079_s19 = scalar_lea.vmem %s2535_s23, 1024  ;;  %s2227_s9 = smov [#allocation2]  }
  0xb5   : > { %p2080_p2 = scmp.ne.s32.totalorder %s2535_s23, %s2079_s19  ;;  %s2084_s15 = sshll.u32 %s2227_s9, 4  ;;  %s2085_s15 = int_to_ptr.vmem [resolvable:$false] %s2084_s15 }
  0xb6   : > { %s2086_s11 = scalar_lea.vmem %s2085_s15, 2048  ;;  %p2087_p8 = scmp.lt.s32.totalorder %s2535_s23, %s2085_s15 }
  0xb7   : > { %p2082_p7 = pnand %p2080_p2, %p2455_p0  ;;  %p2088_p6 = scmp.lt.s32.totalorder %s2086_s11, %s2079_s19 }
  0xb9   : > { %p2083_p10 = pneg %p2082_p7  ;;  %p2089_p3 = por %p2088_p6, %p2087_p8 }
  0xbb   : > { %p2090_p9 = pnand %p2089_p3, %p2083_p10 }
  0xbd   : > { %2093 = shalt.err (!%p2090_p9)
}
  0xbe   : > { %s2228_s16 = smov 256   ;;  %s2229_s18 = smov 16  }
  0xbf   : > { %p2984_p1 = scmp.ne.s32.totalorder %s2977_s13, 0  ;;  %s1693_s5 = sshll.u32 %s2214_s28, 9 }
  0xc0   : > { %s2985_s24 = sshll.u32 %s2430_s12, 5  ;;  %s2567_s15 = scalar_lea.hbm %s2933_s2, %s1693_s5 }
  0xc1   : > { %1767 = dma.hbm_to_vmem [thread:$0]  (!%p2984_p1), %s2533_s14, 1024, %s2535_s23, %s303_s3, %s2228_s16, %s2228_s16, %s2229_s18  }
  0xc2   : > { %s347_s10 = scalar_lea.vmem [#allocation7], %s2985_s24  ;;  %s2094_s11 = scalar_lea.hbm %s2567_s15, 512 }
  0xc3   : > { %s354_s17 = sshll.u32 %s347_s10, 4  ;;  %p2095_p5 = scmp.ne.s32.totalorder %s2567_s15, %s2094_s11  ;;  %s2569_s17 = int_to_ptr.vmem [resolvable:$true] %s354_s17 }
  0xc4   : > { %s2099_s23 = scalar_lea.hbm %s2933_s2, 1024  ;;  %p2100_p13 = scmp.lt.u32.totalorder %s2567_s15, %s2933_s2 }
  0xc5   : > { %p2097_p11 = pnand %p2095_p5, %p2455_p0  ;;  %p2101_p12 = scmp.lt.u32.totalorder %s2099_s23, %s2094_s11 }
  0xc6   : > { %p2103_p7 = scmp.lt.u32.totalorder %s2094_s11, %s2567_s15 }
  0xc7   : > { %p2098_p4 = pneg %p2097_p11  ;;  %p2102_p2 = por %p2101_p12, %p2100_p13 }
  0xc9   : > { %p2104_p10 = por %p2103_p7, %p2102_p2 }
  0xcb   : > { %p2105_p8 = pnand %p2104_p10, %p2098_p4 }
  0xcd   : > { %2108 = shalt.err (!%p2105_p8)
}
  0xce   : > { %s2109_s18 = scalar_lea.vmem %s2569_s17, 512  ;;  %s2230_s5 = smov [#allocation7]  }
  0xcf   : > { %p2110_p6 = scmp.ne.s32.totalorder %s2569_s17, %s2109_s18  ;;  %s2114_s24 = sshll.u32 %s2230_s5, 4  ;;  %s2115_s24 = int_to_ptr.vmem [resolvable:$false] %s2114_s24 }
  0xd0   : > { %s2116_s10 = scalar_lea.vmem %s2115_s24, 1024  ;;  %p2117_p5 = scmp.lt.s32.totalorder %s2569_s17, %s2115_s24 }
  0xd1   : > { %p2112_p3 = pnand %p2110_p6, %p2455_p0  ;;  %p2118_p11 = scmp.lt.s32.totalorder %s2116_s10, %s2109_s18 }
  0xd3   : > { %p2113_p9 = pneg %p2112_p3  ;;  %p2119_p13 = por %p2118_p11, %p2117_p5 }
  0xd5   : > { %p2120_p12 = pnand %p2119_p13, %p2113_p9 }
  0xd7   : > { %2123 = shalt.err (!%p2120_p12)
}
  0xd8   : > { %1773 = dma.hbm_to_vmem [thread:$0]  (!%p2984_p1), %s2567_s15, 512, %s2569_s17, %s2449_s22, %s2983_s26, %s2983_s26, %s2982_s1  }
  0xd9   : > { %p2986_p0 = scmp.ne.s32.totalorder %s2965_s8, 0 }
  0xda   : > { %s2599_s29 = sand.u32 (!%p2986_p0), 1, %s2202_s25   ;;  %p2987_p4 = scmp.ne.s32.totalorder (!%p2986_p0), %s2972_s20, 0 }
  0xdb   : > { %366 = sbr.rel (%p2986_p0) target bundleno = 1715 (0x6b3), region = 48  ;;  %s1662_s19 = sshll.u32 (!%p2986_p0), %s2599_s29, 6 }
  0xdc   : > { %s369_s9 = scalar_lea.sflag (!%p2986_p0), [#allocation3], %s2599_s29  ;;  %s2605_s13 = scalar_lea.vmem (!%p2986_p0), [#allocation2], %s1662_s19 }
  0xe2   : > { %2177 = dma.done.wait (%p2987_p4), %s369_s9, 1024  }
  0xe3   : > { %2179 = vsyncadd (%p2987_p4), %s369_s9, 4294966272  ;;  %s377_s8 = sand.u32 1, %s2314_s30   ;;  %s1663_s22 = sshll.u32 %s2599_s29, 3 }
  0xe4   : > { %s378_s1 = scalar_lea.sflag [#allocation6], %s377_s8  ;;  %s2613_s26 = scalar_lea.vmem [#allocation5], %s1663_s22 }
  0xe5   : > { %2181 = dma.done.wait (%p2987_p4), %s378_s1, 640  }
  0xe6   : > { %2183 = vsyncadd (%p2987_p4), %s378_s1, 4294966656  ;;  %s1664_s17 = sshll.u32 %s2599_s29, 5  ;;  %p2988_p1 = scmp.eq.s32.totalorder %s2314_s30, 0 }
  0xe7   : > { %s2620_s15 = scalar_lea.vmem [#allocation7], %s1664_s17 }
  0xe8   : > { %2185 = dma.done.wait (%p2988_p1), [#allocation9], 1024   ;;  %p2989_p2 = pmov %p2988_p1 }
  0xe9   : > { %p2990_p7 = pmov %p2988_p1 }
  0xea   : > { %2187 = vsyncadd (%p2989_p2), [#allocation9], 4294966272 }
  0xeb   : > { %2189 = dma.done.wait (%p2990_p7), [#allocation12], 1024   ;;  %p2991_p10 = pmov %p2988_p1 }
  0xec   : > { %v2231_v0 = vmov 1   ;;  %v2232_v1 = vmov 0   ;;  %v2630_v2 = vld [vmem:[#allocation13] sm:$0xff]  ;;  %v2634_v3 = vld [vmem:[#allocation13 + $0x8] sm:$0xff]  ;;  %v2638_v4 = vld [vmem:[#allocation13 + $0x10] sm:$0xff]  ;;  %v2233_v11 = vmov 0.0  }
  0xed   : > { %2191 = vsyncadd (%p2991_p10), [#allocation12], 4294966272  ;;  %1856 = vset.pattern.permute.xlu1 %v2231_v0  ;;  %1855 = vset.pattern.permute.xlu0 %v2232_v1  ;;  %v2640_v5 = vld [vmem:[#allocation13 + $0x18] sm:$0xff]  ;;  %v2647_v6 = vld [vmem:[%s2605_s13] sm:$0xff]  ;;  %v2234_v23 = vmov 2   ;;  %vm607_vm0 = vcmask 261120  }
  0xee   : > { %564 = vperm.xlu1 %1856, %v2630_v2   ;;  %537 = vperm.xlu0 %1855, %v2630_v2   ;;  %v2650_v7 = vld [vmem:[%s2605_s13 + $0x10] sm:$0xff]  ;;  %v2653_v8 = vld [vmem:[%s2605_s13 + $0x8] sm:$0xff]  ;;  %v2656_v9 = vld [vmem:[%s2605_s13 + $0x18] sm:$0xff]  ;;  %vm833_vm1 = vcmask 64512   ;;  %s2859_s30 = scalar_lea.vmem [#allocation14], %s1662_s19  ;;  %s1694_s11 = sshll.u32 %s2210_s27, 10 }
  0xef   : > { %v466_v10 = vadd.f32 %v2650_v7, %v2647_v6  ;;  %684 = vmatprep.mubr.f32.mxu0 %v2233_v11  ;;  %776 = vmatprep.mubr.f32.mxu1 %v2233_v11  ;;  %v2663_v12 = vld [vmem:[%s2605_s13 + $0x20] sm:$0xff]  ;;  %v475_v13 = vadd.f32 %v2656_v9, %v2653_v8  ;;  %v2668_v14 = vld [vmem:[%s2605_s13 + $0x28] sm:$0xff]  ;;  %v2672_v16 = vld [vmem:[%s2605_s13 + $0x30] sm:$0xff]  ;;  %s1477_s20 = sshll.u32 %s2859_s30, 4  ;;  %s2879_s23 = scalar_lea.hbm %s2938_s7, %s1694_s11  ;;  %s2872_s20 = int_to_ptr.vmem [resolvable:$true] %s1477_s20 }
  0xf0   : > { %v2676_v18 = vld [vmem:[%s2605_s13 + $0x38] sm:$0xff]  ;;  %s1462_s27 = scalar_lea.sflag [#allocation4], %s2599_s29  ;;  %s2124_s3 = scalar_lea.vmem %s2872_s20, 1024 }
  0xf1   : > { %v467_v15 = vadd.f32 %v466_v10, %v2663_v12  ;;  %v476_v17 = vadd.f32 %v475_v13, %v2668_v14  ;;  %p2125_p8 = scmp.ne.s32.totalorder %s2872_s20, %s2124_s3  ;;  %p2992_p6 = scmp.ne.s32.totalorder %s2973_s21, 0 }
  0xf2   : > { %568 = vperm.xlu1 %1856, %v2634_v3   ;;  %542 = vperm.xlu0 %1855, %v2634_v3   ;;  %s2240_s16 = smov [#allocation14]  }
  0xf3   : > { %v468_v19 = vadd.f32 %v467_v15, %v2672_v16  ;;  %v477_v20 = vadd.f32 %v476_v17, %v2676_v18  ;;  %p2126_p3 = pnand %p2125_p8, %p2992_p6  ;;  %s2128_s18 = sshll.u32 %s2240_s16, 4  ;;  %s2129_s18 = int_to_ptr.vmem [resolvable:$false] %s2128_s18 }
  0xf4   : > { %s2130_s5 = scalar_lea.vmem %s2129_s18, 2048  ;;  %p2131_p5 = scmp.lt.s32.totalorder %s2872_s20, %s2129_s18 }
  0xf5   : > { %v469_v21 = vrot.slane %v468_v19, 4  ;;  %v478_v22 = vrot.slane %v477_v20, 4  ;;  %p2127_p9 = pneg %p2126_p3  ;;  %p2132_p11 = scmp.lt.s32.totalorder %s2130_s5, %s2124_s3 }
  0xf6   : > { %1857 = vset.pattern.permute.xlu1 %v2232_v1  ;;  %547 = vperm.xlu0 %1855, %v2638_v4  }
  0xf7   : > { %552 = vperm.xlu1 %1857, %v2640_v5   ;;  %v470_v24 = vadd.f32 %v469_v21, %v468_v19  ;;  %v479_v25 = vadd.f32 %v478_v22, %v477_v20  ;;  %p2133_p13 = por %p2132_p11, %p2131_p5 }
  0xf9   : > { %v471_v26 = vrot.slane %v470_v24, 2  ;;  %v480_v27 = vrot.slane %v479_v25, 2  ;;  %p2134_p12 = pnand %p2133_p13, %p2127_p9 }
  0xfa   : > { %1858 = vset.pattern.permute.xlu0 %v2231_v0 }
  0xfb   : > { %1859 = vset.pattern.permute.xlu1 %v2231_v0  ;;  %572 = vperm.xlu0 %1858, %v2638_v4   ;;  %v472_v28 = vadd.f32 %v471_v26, %v470_v24  ;;  %v481_v29 = vadd.f32 %v480_v27, %v479_v25 }
  0xfc   : > { %576 = vperm.xlu1 %1859, %v2640_v5  }
  0xfd   : > { %v473_v30 = vrot.slane %v472_v28, 1  ;;  %v482_v31 = vrot.slane %v481_v29, 1 }
  0xff   : > { %1861 = vset.pattern.permute.xlu0 %v2234_v23  ;;  %v474_v32 = vadd.f32 %v473_v30, %v472_v28  ;;  %v483_v33 = vadd.f32 %v482_v31, %v481_v29 }
 0x100   : > { %1860 = vset.pattern.permute.xlu1 %v2234_v23  ;;  %596 = vperm.xlu0 %1861, %v2634_v3  }
 0x101   : > { %592 = vperm.xlu1 %1860, %v2630_v2   ;;  %v485_v34 = vmul.f32 0.03125, %v474_v32  ;;  %v486_v35 = vmul.f32 0.03125, %v483_v33 }
 0x103   : > { %v487_v36 = vsub.f32 %v2647_v6, %v485_v34  ;;  %v489_v37 = vsub.f32 %v2650_v7, %v485_v34  ;;  %v488_v38 = vsub.f32 %v2653_v8, %v486_v35  ;;  %v490_v39 = vsub.f32 %v2656_v9, %v486_v35 }
 0x104   : > { %v491_v40 = vsub.f32 %v2663_v12, %v485_v34  ;;  %v492_v43 = vsub.f32 %v2668_v14, %v486_v35  ;;  %v493_v46 = vsub.f32 %v2672_v16, %v485_v34  ;;  %v494_v49 = vsub.f32 %v2676_v18, %v486_v35 }
 0x105   : > { %600 = vperm.xlu1 %1860, %v2638_v4   ;;  %v495_v41 = vmul.f32 %v487_v36, %v487_v36  ;;  %v497_v42 = vmul.f32 %v489_v37, %v489_v37  ;;  %v496_v44 = vmul.f32 %v488_v38, %v488_v38  ;;  %v498_v45 = vmul.f32 %v490_v39, %v490_v39 }
 0x106   : > { %v499_v47 = vmul.f32 %v491_v40, %v491_v40  ;;  %v500_v50 = vmul.f32 %v492_v43, %v492_v43  ;;  %v501_v52 = vmul.f32 %v493_v46, %v493_v46  ;;  %v502_v54 = vmul.f32 %v494_v49, %v494_v49 }
 0x107   : > { %v503_v48 = vadd.f32 %v497_v42, %v495_v41  ;;  %v512_v51 = vadd.f32 %v498_v45, %v496_v44 }
 0x109   : > { %604 = vperm.xlu1 %1860, %v2640_v5   ;;  %v504_v53 = vadd.f32 %v503_v48, %v499_v47  ;;  %v513_v55 = vadd.f32 %v512_v51, %v500_v50 }
 0x10b   : > { %v505_v56 = vadd.f32 %v504_v53, %v501_v52  ;;  %v514_v57 = vadd.f32 %v513_v55, %v502_v54 }
 0x10d   : > { %v506_v58 = vrot.slane %v505_v56, 4  ;;  %v515_v59 = vrot.slane %v514_v57, 4 }
 0x10f   : > { %v507_v60 = vadd.f32 %v506_v58, %v505_v56  ;;  %v516_v61 = vadd.f32 %v515_v59, %v514_v57 }
 0x111   : > { %v508_v62 = vrot.slane %v507_v60, 2  ;;  %v517_v63 = vrot.slane %v516_v61, 2 }
 0x113   : > { %v509_v0 = vadd.f32 %v508_v62, %v507_v60  ;;  %v518_v1 = vadd.f32 %v517_v63, %v516_v61 }
 0x115   : > { %v510_v10 = vrot.slane %v509_v0, 1  ;;  %v519_v13 = vrot.slane %v518_v1, 1 }
 0x117   : > { %v511_v15 = vadd.f32 %v510_v10, %v509_v0  ;;  %v520_v17 = vadd.f32 %v519_v13, %v518_v1  ;;  %v590_v0 = vld [vmem:[#allocation8 + $0x18] sm:$0xff] }
 0x119   : > { %v521_v19 = vmul.f32 0.03125, %v511_v15  ;;  %v522_v20 = vmul.f32 0.03125, %v520_v17 }
 0x11b   : > { %v523_v21 = vadd.f32 1e-05, %v521_v19  ;;  %v524_v22 = vadd.f32 1e-05, %v522_v20 }
 0x11d   : > { %1874 = vrsqrt.f32 %v523_v21 }
 0x11e   : > { %1876 = vrsqrt.f32 %v524_v22 }
 0x127   : > { %v1875_v23 = vpop.eup %1874 }
 0x128   : > { %v1877_v24 = vpop.eup %1876  ;;  %v527_v25 = vmul.f32 %v1875_v23, %v487_v36  ;;  %v529_v29 = vmul.f32 %v1875_v23, %v489_v37  ;;  %v531_v50 = vmul.f32 %v1875_v23, %v491_v40  ;;  %v533_v36 = vmul.f32 %v1875_v23, %v493_v46  ;;  %v588_v46 = vld [vmem:[#allocation8 + $0x8] sm:$0xff] }
 0x129   : > { %v528_v26 = vmul.f32 %v1877_v24, %v488_v38  ;;  %v530_v30 = vmul.f32 %v1877_v24, %v490_v39  ;;  %v532_v51 = vmul.f32 %v1877_v24, %v492_v43  ;;  %v534_v38 = vmul.f32 %v1877_v24, %v494_v49  ;;  %v587_v43 = vld [vmem:[#allocation8] sm:$0xff]  ;;  %v589_v49 = vld [vmem:[#allocation8 + $0x10] sm:$0xff] }
 0x16d   : > { %v565_v27 = vpop.permute.xlu1 %564  ;;  %v538_v28 = vpop.permute.xlu0 %537 }
 0x16e   : > { %v555_v31 = vmul.f32 %v538_v28, %v527_v25  ;;  %v556_v32 = vmul.f32 %v538_v28, %v528_v26 }
 0x170   : > { %v580_v42 = vadd.f32 %v565_v27, %v556_v32  ;;  %v579_v45 = vadd.f32 %v565_v27, %v555_v31 }
 0x171   : > { %v569_v33 = vpop.permute.xlu1 %568  ;;  %v543_v34 = vpop.permute.xlu0 %542 }
 0x172   : > { %v557_v35 = vmul.f32 %v543_v34, %v529_v29  ;;  %v558_v41 = vmul.f32 %v543_v34, %v530_v30 }
 0x174   : > { %v582_v44 = vadd.f32 %v569_v33, %v558_v41  ;;  %v581_v47 = vadd.f32 %v569_v33, %v557_v35 }
 0x175   : > { %v548_v48 = vpop.permute.xlu0 %547 }
 0x176   : > { %v553_v52 = vpop.permute.xlu1 %552  ;;  %v1695_v53 = vpack.c.bf16 %v582_v44, %v580_v42  ;;  %v1697_v54 = vpack.c.bf16 %v581_v47, %v579_v45  ;;  %v559_v37 = vmul.f32 %v548_v48, %v531_v50  ;;  %v560_v39 = vmul.f32 %v548_v48, %v532_v51  ;;  %v457_v44 = vld [vmem:[%s2613_s26] sm:$0xff] }
 0x177   : > { %v561_v55 = vmul.f32 %v553_v52, %v533_v36  ;;  %v562_v56 = vmul.f32 %v553_v52, %v534_v38  ;;  %v2235_v45 = vmov 3   ;;  %v2236_v47 = vmov 4  }
 0x178   : > { %1696 = vmatprep.subr.bf16.mxu0 %v1695_v53  ;;  %1862 = vset.pattern.permute.xlu0 %v2235_v45  ;;  %v2237_v48 = vmov 5  }
 0x179   : > { %1698 = vmatpush1.bf16.msra.mxu0 %v1697_v54  ;;  %1863 = vset.pattern.permute.xlu1 %v2235_v45 }
 0x17a   : > { %v573_v57 = vpop.permute.xlu0 %572  ;;  %818 = vperm.xlu0 %1862, %v2630_v2   ;;  %822 = vperm.xlu1 %1863, %v2634_v3  }
 0x17b   : > { %v583_v58 = vadd.f32 %v573_v57, %v559_v37  ;;  %v584_v59 = vadd.f32 %v573_v57, %v560_v39  ;;  %v577_v60 = vpop.permute.xlu1 %576 }
 0x17c   : > { %v585_v61 = vadd.f32 %v577_v60, %v561_v55  ;;  %v586_v62 = vadd.f32 %v577_v60, %v562_v56 }
 0x17e   : > { %v1699_v63 = vpack.c.bf16 %v586_v62, %v584_v59  ;;  %v1701_v40 = vpack.c.bf16 %v585_v61, %v583_v58  ;;  %826 = vperm.xlu1 %1863, %v2638_v4   ;;  %830 = vperm.xlu0 %1862, %v2640_v5  }
 0x17f   : > { %v597_v15 = vpop.permute.xlu0 %596 }
 0x180   : > { %1700 = vmatprep.subr.bf16.mxu0 %v1699_v63  ;;  %v593_v1 = vpop.permute.xlu1 %592 }
 0x181   : > { %1702 = vmatpush1.bf16.msra.mxu0 %v1701_v40 }
 0x182   : > { %1864 = vset.pattern.permute.xlu1 %v2236_v47  ;;  %1865 = vset.pattern.permute.xlu0 %v2236_v47 }
 0x183   : > { %1012 = vperm.xlu1 %1864, %v2630_v2   ;;  %1016 = vperm.xlu0 %1865, %v2634_v3  }
 0x184   : > { %1670 = vmatmul.mubr.msk.f32.vlgmr.msra.gmra.mrb[0].mxu0 %vm607_vm0, %v587_v43  ;;  %v601_v22 = vpop.permute.xlu1 %600 }
 0x185   : > { %690 = vmatprep.mubr.f32.mxu0 %v2233_v11 }
 0x187   : > { %1866 = vset.pattern.permute.xlu1 %v2237_v48  ;;  %1020 = vperm.xlu0 %1865, %v2638_v4  }
 0x188   : > { %1671 = vmatmul.mubr.msk.f32.gmra.mrb[2].mxu0 %vm607_vm0, %v588_v46  ;;  %v605_v29 = vpop.permute.xlu1 %604  ;;  %1036 = vperm.xlu1 %1866, %v2630_v2  }
 0x189   : > { %696 = vmatprep.mubr.f32.mxu0 %v2233_v11 }
 0x18b   : > { %1868 = vset.pattern.permute.xlu0 %v2237_v48 }
 0x18c   : > { %1672 = vmatmul.mubr.msk.f32.gmra.mrb[4].mxu0 %vm607_vm0, %v589_v49  ;;  %1040 = vperm.xlu1 %1866, %v2634_v3  }
 0x18d   : > { %702 = vmatprep.mubr.f32.mxu0 %v2233_v11  ;;  %1044 = vperm.xlu0 %1868, %v2638_v4  }
 0x190   : > { %1673 = vmatmul.mubr.msk.f32.gmra.mrb[6].mxu0 %vm607_vm0, %v590_v0  ;;  %1867 = vset.pattern.permute.xlu1 %v2236_v47 }
 0x191   : > { %1227 = vmatprep.mubr.f32.mxu0 %v2233_v11  ;;  %1024 = vperm.xlu1 %1867, %v2640_v5  }
 0x195   : > { %1869 = vset.pattern.permute.xlu1 %v2237_v48 }
 0x196   : > { %1048 = vperm.xlu1 %1869, %v2640_v5  }
 0x257   : > { %v686_v10 = vpop.f32.mrb[0].mxu0 }
 0x258   : > { %v688_v13 = vpop.f32.mrb[1].mxu0  ;;  %v687_v19 = vadd.f32 %v686_v10, %v593_v1 }
 0x259   : > { %v689_v23 = vadd.f32 %v688_v13, %v593_v1 }
 0x25b   : > { %v692_v17 = vpop.f32.mrb[2].mxu0 }
 0x25c   : > { %v693_v20 = vadd.f32 %v692_v17, %v597_v15  ;;  %v694_v21 = vpop.f32.mrb[3].mxu0 }
 0x25d   : > { %v695_v24 = vadd.f32 %v694_v21, %v597_v15 }
 0x25e   : > { %v1705_v25 = vpack.c.bf16 %v693_v20, %v687_v19 }
 0x25f   : > { %v698_v26 = vpop.f32.mrb[4].mxu0  ;;  %v1703_v27 = vpack.c.bf16 %v695_v24, %v689_v23 }
 0x260   : > { %v700_v28 = vpop.f32.mrb[5].mxu0  ;;  %v699_v31 = vadd.f32 %v698_v26, %v601_v22 }
 0x261   : > { %1704 = vmatprep.subr.bf16.mxu1 %v1703_v27  ;;  %v701_v34 = vadd.f32 %v700_v28, %v601_v22  ;;  %v458_v27 = vld [vmem:[%s2620_s15] sm:$0xff]  ;;  %v459_v28 = vld [vmem:[%s2620_s15 + $0x8] sm:$0xff] }
 0x262   : > { %1706 = vmatpush1.bf16.msra.mxu1 %v1705_v25 }
 0x263   : > { %v704_v30 = vpop.f32.mrb[6].mxu0 }
 0x264   : > { %v705_v32 = vadd.f32 %v704_v30, %v605_v29  ;;  %v706_v33 = vpop.f32.mrb[7].mxu0  ;;  %v461_v30 = vld [vmem:[%s2620_s15 + $0x18] sm:$0xff] }
 0x265   : > { %v707_v35 = vadd.f32 %v706_v33, %v605_v29  ;;  %v460_v29 = vld [vmem:[%s2620_s15 + $0x10] sm:$0xff]  ;;  %v823_v33 = vpop.permute.xlu1 %822 }
 0x266   : > { %v1709_v41 = vpack.c.bf16 %v705_v32, %v699_v31  ;;  %v2238_v31 = vmov 6  }
 0x267   : > { %v1707_v42 = vpack.c.bf16 %v707_v35, %v701_v34  ;;  %1870 = vset.pattern.permute.xlu1 %v2238_v31  ;;  %1871 = vset.pattern.permute.xlu0 %v2238_v31  ;;  %v819_v35 = vpop.permute.xlu0 %818 }
 0x268   : > { %1136 = vperm.xlu1 %1870, %v2630_v2   ;;  %1140 = vperm.xlu0 %1871, %v2634_v3  }
 0x269   : > { %1708 = vmatprep.subr.bf16.mxu1 %v1707_v42  ;;  %v827_v47 = vpop.permute.xlu1 %826 }
 0x26a   : > { %1710 = vmatpush1.bf16.msra.mxu1 %v1709_v41 }
 0x26c   : > { %1144 = vperm.xlu1 %1870, %v2638_v4  }
 0x26d   : > { %1674 = vmatmul.mubr.msk.f32.vlgmr.msra.gmra.mrb[0].mxu1 %vm607_vm0, %v457_v44 }
 0x26e   : > { %910 = vmatprep.mubr.f32.mxu1 %v2233_v11 }
 0x270   : > { %1148 = vperm.xlu1 %1870, %v2640_v5  }
 0x340   : > { %v778_v50 = vpop.f32.mrb[0].mxu1 }
 0x341   : > { %v783_v51 = vrot.slane %v778_v50, 4  ;;  %v780_v52 = vpop.f32.mrb[1].mxu1 }
 0x342   : > { %v789_v36 = vrot.slane %v780_v52, 4 }
 0x343   : > { %v784_v38 = vmax.f32 %v778_v50, %v783_v51 }
 0x344   : > { %v790_v53 = vmax.f32 %v780_v52, %v789_v36 }
 0x345   : > { %v785_v54 = vrot.slane %v784_v38, 2 }
 0x346   : > { %v791_v37 = vrot.slane %v790_v53, 2 }
 0x347   : > { %v786_v39 = vmax.f32 %v784_v38, %v785_v54 }
 0x348   : > { %v792_v55 = vmax.f32 %v790_v53, %v791_v37 }
 0x349   : > { %v787_v56 = vrot.slane %v786_v39, 1 }
 0x34a   : > { %v793_v57 = vrot.slane %v792_v55, 1 }
 0x34b   : > { %v788_v58 = vmax.f32 %v786_v39, %v787_v56  ;;  %v831_v56 = vpop.permute.xlu0 %830 }
 0x34c   : > { %v794_v59 = vmax.f32 %v792_v55, %v793_v57 }
 0x34d   : > { %v795_v60 = vsub.f32 %v778_v50, %v788_v58 }
 0x34e   : > { %v796_v61 = vsub.f32 %v780_v52, %v794_v59 }
 0x34f   : > { %v797_v62 = vmul.f32 1.442695, %v795_v60 }
 0x350   : > { %v799_v63 = vmul.f32 1.442695, %v796_v61 }
 0x351   : > { %1878 = vpow2.f32 %v797_v62 }
 0x352   : > { %1880 = vpow2.f32 %v799_v63 }
 0x35b   : > { %v1879_v40 = vpop.eup %1878 }
 0x35c   : > { %v1881_v43 = vpop.eup %1880  ;;  %v801_v46 = vrot.slane %v1879_v40, 4 }
 0x35d   : > { %v807_v49 = vrot.slane %v1881_v43, 4 }
 0x35e   : > { %v802_v0 = vadd.f32 %v1879_v40, %v801_v46 }
 0x35f   : > { %v808_v1 = vadd.f32 %v1881_v43, %v807_v49 }
 0x360   : > { %v803_v10 = vrot.slane %v802_v0, 2 }
 0x361   : > { %v809_v13 = vrot.slane %v808_v1, 2 }
 0x362   : > { %v804_v15 = vadd.f32 %v803_v10, %v802_v0 }
 0x363   : > { %v810_v17 = vadd.f32 %v809_v13, %v808_v1 }
 0x364   : > { %v805_v19 = vrot.slane %v804_v15, 1 }
 0x365   : > { %v811_v20 = vrot.slane %v810_v17, 1 }
 0x366   : > { %v806_v21 = vadd.f32 %v805_v19, %v804_v15 }
 0x367   : > { %v812_v22 = vadd.f32 %v811_v20, %v810_v17 }
 0x368   : > { %1882 = vrcp.f32 %v806_v21 }
 0x369   : > { %1884 = vrcp.f32 %v812_v22 }
 0x372   : > { %v1883_v23 = vpop.eup %1882 }
 0x373   : > { %v1885_v24 = vpop.eup %1884  ;;  %v815_v26 = vmul.f32 %v1883_v23, %v1879_v40 }
 0x374   : > { %v816_v25 = vmul.f32 %v1885_v24, %v1881_v43 }
 0x376   : > { %846 = vmatprep.subr.mxu1 %v816_v25 }
 0x377   : > { %847 = vmatpush1.msra.mxu1 %v815_v26 }
 0x378   : > { %1675 = vmatmul.mubr.msk.f32.vlgmr.msra.gmra.mrb[2].mxu1 %vm833_vm1, %v458_v27 }
 0x379   : > { %916 = vmatprep.mubr.f32.mxu1 %v2233_v11 }
 0x37c   : > { %1676 = vmatmul.mubr.msk.f32.gmra.mrb[4].mxu1 %vm833_vm1, %v459_v28 }
 0x37d   : > { %922 = vmatprep.mubr.f32.mxu1 %v2233_v11 }
 0x380   : > { %1677 = vmatmul.mubr.msk.f32.gmra.mrb[6].mxu1 %vm833_vm1, %v460_v29 }
 0x381   : > { %928 = vmatprep.mubr.f32.mxu1 %v2233_v11 }
 0x384   : > { %1678 = vmatmul.mubr.msk.f32.gmra.mrb[8].mxu1 %vm833_vm1, %v461_v30 }
 0x385   : > { %1420 = vmatprep.mubr.f32.mxu1 %v2233_v11 }
 0x44b   : > { %v912_v32 = vpop.f32.mrb[2].mxu1 }
 0x44c   : > { %v914_v34 = vpop.f32.mrb[3].mxu1  ;;  %v913_v48 = vadd.f32 %v912_v32, %v819_v35 }
 0x44d   : > { %v915_v50 = vadd.f32 %v914_v34, %v819_v35 }
 0x44e   : > { %v2734_v37 = vadd.f32 %v913_v48, %v2647_v6 }
 0x44f   : > { %v918_v41 = vpop.f32.mrb[4].mxu1  ;;  %v2740_v55 = vadd.f32 %v915_v50, %v2653_v8 }
 0x450   : > { %v919_v42 = vadd.f32 %v918_v41, %v823_v33  ;;  %v920_v44 = vpop.f32.mrb[5].mxu1 }
 0x451   : > { %v921_v45 = vadd.f32 %v920_v44, %v823_v33 }
 0x452   : > { %v2728_v52 = vadd.f32 %v919_v42, %v2650_v7 }
 0x453   : > { %v924_v51 = vpop.f32.mrb[6].mxu1  ;;  %v2731_v53 = vadd.f32 %v921_v45, %v2656_v9 }
 0x454   : > { %v925_v36 = vadd.f32 %v924_v51, %v827_v47  ;;  %v926_v38 = vpop.f32.mrb[7].mxu1  ;;  %v943_v58 = vadd.f32 %v2728_v52, %v2734_v37 }
 0x455   : > { %v927_v54 = vadd.f32 %v926_v38, %v827_v47  ;;  %v952_v6 = vadd.f32 %v2731_v53, %v2740_v55 }
 0x456   : > { %v2737_v39 = vadd.f32 %v925_v36, %v2663_v12 }
 0x457   : > { %v2743_v57 = vadd.f32 %v927_v54, %v2668_v14  ;;  %v930_v7 = vpop.f32.mrb[8].mxu1 }
 0x458   : > { %v931_v9 = vadd.f32 %v930_v7, %v831_v56  ;;  %v932_v59 = vpop.f32.mrb[9].mxu1  ;;  %v944_v12 = vadd.f32 %v943_v58, %v2737_v39 }
 0x459   : > { %v933_v60 = vadd.f32 %v932_v59, %v831_v56  ;;  %v953_v8 = vadd.f32 %v952_v6, %v2743_v57  ;;  %v1013_v56 = vpop.permute.xlu1 %1012 }
 0x45a   : > { %v2751_v61 = vadd.f32 %v931_v9, %v2672_v16 }
 0x45b   : > { %v2755_v14 = vadd.f32 %v933_v60, %v2676_v18 }
 0x45c   : > { %v945_v62 = vadd.f32 %v944_v12, %v2751_v61 }
 0x45d   : > { %v954_v63 = vadd.f32 %v953_v8, %v2755_v14  ;;  %v1037_v8 = vpop.permute.xlu1 %1036 }
 0x45e   : > { %v946_v40 = vrot.slane %v945_v62, 4 }
 0x45f   : > { %v955_v43 = vrot.slane %v954_v63, 4 }
 0x460   : > { %v947_v46 = vadd.f32 %v946_v40, %v945_v62 }
 0x461   : > { %v956_v49 = vadd.f32 %v955_v43, %v954_v63 }
 0x462   : > { %v948_v0 = vrot.slane %v947_v46, 2 }
 0x463   : > { %v957_v1 = vrot.slane %v956_v49, 2 }
 0x464   : > { %v949_v10 = vadd.f32 %v948_v0, %v947_v46  ;;  %v1017_v0 = vpop.permute.xlu0 %1016 }
 0x465   : > { %v958_v13 = vadd.f32 %v957_v1, %v956_v49  ;;  %v1041_v49 = vpop.permute.xlu1 %1040 }
 0x466   : > { %v950_v15 = vrot.slane %v949_v10, 1 }
 0x467   : > { %v959_v16 = vrot.slane %v958_v13, 1 }
 0x468   : > { %v951_v17 = vadd.f32 %v950_v15, %v949_v10  ;;  %v1021_v10 = vpop.permute.xlu0 %1020 }
 0x469   : > { %v960_v19 = vadd.f32 %v959_v16, %v958_v13  ;;  %v1025_v1 = vpop.permute.xlu1 %1024 }
 0x46a   : > { %v961_v20 = vmul.f32 0.03125, %v951_v17 }
 0x46b   : > { %v962_v21 = vmul.f32 0.03125, %v960_v19 }
 0x46c   : > { %v963_v18 = vsub.f32 %v2734_v37, %v961_v20  ;;  %v965_v22 = vsub.f32 %v2728_v52, %v961_v20  ;;  %v967_v23 = vsub.f32 %v2737_v39, %v961_v20  ;;  %v969_v27 = vsub.f32 %v2751_v61, %v961_v20 }
 0x46d   : > { %v964_v24 = vsub.f32 %v2740_v55, %v962_v21  ;;  %v966_v25 = vsub.f32 %v2731_v53, %v962_v21  ;;  %v968_v26 = vsub.f32 %v2743_v57, %v962_v21  ;;  %v970_v30 = vsub.f32 %v2755_v14, %v962_v21 }
 0x46e   : > { %v971_v28 = vmul.f32 %v963_v18, %v963_v18  ;;  %v973_v29 = vmul.f32 %v965_v22, %v965_v22  ;;  %v975_v33 = vmul.f32 %v967_v23, %v967_v23  ;;  %v977_v42 = vmul.f32 %v969_v27, %v969_v27 }
 0x46f   : > { %v972_v31 = vmul.f32 %v964_v24, %v964_v24  ;;  %v974_v32 = vmul.f32 %v966_v25, %v966_v25  ;;  %v976_v35 = vmul.f32 %v968_v26, %v968_v26  ;;  %v978_v45 = vmul.f32 %v970_v30, %v970_v30 }
 0x470   : > { %v979_v34 = vadd.f32 %v973_v29, %v971_v28 }
 0x471   : > { %v988_v41 = vadd.f32 %v974_v32, %v972_v31  ;;  %v1049_v32 = vpop.permute.xlu1 %1048 }
 0x472   : > { %v980_v44 = vadd.f32 %v979_v34, %v975_v33  ;;  %v1045_v33 = vpop.permute.xlu0 %1044 }
 0x473   : > { %v989_v47 = vadd.f32 %v988_v41, %v976_v35 }
 0x474   : > { %v981_v48 = vadd.f32 %v980_v44, %v977_v42 }
 0x475   : > { %v990_v50 = vadd.f32 %v989_v47, %v978_v45 }
 0x476   : > { %v982_v51 = vrot.slane %v981_v48, 4 }
 0x477   : > { %v991_v36 = vrot.slane %v990_v50, 4 }
 0x478   : > { %v983_v38 = vadd.f32 %v982_v51, %v981_v48 }
 0x479   : > { %v992_v54 = vadd.f32 %v991_v36, %v990_v50 }
 0x47a   : > { %v984_v7 = vrot.slane %v983_v38, 2 }
 0x47b   : > { %v993_v58 = vrot.slane %v992_v54, 2 }
 0x47c   : > { %v985_v9 = vadd.f32 %v984_v7, %v983_v38 }
 0x47d   : > { %v994_v59 = vadd.f32 %v993_v58, %v992_v54 }
 0x47e   : > { %v986_v6 = vrot.slane %v985_v9, 1 }
 0x47f   : > { %v995_v60 = vrot.slane %v994_v59, 1 }
 0x480   : > { %v987_v12 = vadd.f32 %v986_v6, %v985_v9 }
 0x481   : > { %v996_v62 = vadd.f32 %v995_v60, %v994_v59 }
 0x482   : > { %v997_v63 = vmul.f32 0.03125, %v987_v12 }
 0x483   : > { %v998_v40 = vmul.f32 0.03125, %v996_v62 }
 0x484   : > { %v999_v43 = vadd.f32 1e-05, %v997_v63 }
 0x485   : > { %v1000_v46 = vadd.f32 1e-05, %v998_v40 }
 0x486   : > { %1886 = vrsqrt.f32 %v999_v43 }
 0x487   : > { %1888 = vrsqrt.f32 %v1000_v46 }
 0x490   : > { %v1887_v13 = vpop.eup %1886 }
 0x491   : > { %v1889_v15 = vpop.eup %1888  ;;  %v1003_v16 = vmul.f32 %v1887_v13, %v963_v18  ;;  %v1005_v17 = vmul.f32 %v1887_v13, %v965_v22  ;;  %v1009_v19 = vmul.f32 %v1887_v13, %v969_v27  ;;  %v1007_v20 = vmul.f32 %v1887_v13, %v967_v23 }
 0x492   : > { %v1004_v21 = vmul.f32 %v1889_v15, %v964_v24  ;;  %v1006_v28 = vmul.f32 %v1889_v15, %v966_v25  ;;  %v1010_v29 = vmul.f32 %v1889_v15, %v970_v30  ;;  %v1008_v31 = vmul.f32 %v1889_v15, %v968_v26 }
 0x493   : > { %v1027_v34 = vmul.f32 %v1013_v56, %v1003_v16  ;;  %v1029_v35 = vmul.f32 %v1017_v0, %v1005_v17  ;;  %v1033_v41 = vmul.f32 %v1025_v1, %v1009_v19  ;;  %v1031_v42 = vmul.f32 %v1021_v10, %v1007_v20 }
 0x494   : > { %v1028_v44 = vmul.f32 %v1013_v56, %v1004_v21  ;;  %v1030_v45 = vmul.f32 %v1017_v0, %v1006_v28  ;;  %v1034_v47 = vmul.f32 %v1025_v1, %v1010_v29  ;;  %v1032_v48 = vmul.f32 %v1021_v10, %v1008_v31 }
 0x495   : > { %v1051_v50 = vadd.f32 %v1037_v8, %v1027_v34  ;;  %v1053_v51 = vadd.f32 %v1041_v49, %v1029_v35  ;;  %v2767_v18 = vadd.f32 %v1049_v32, %v1033_v41  ;;  %v2769_v22 = vadd.f32 %v1045_v33, %v1031_v42 }
 0x496   : > { %v1052_v23 = vadd.f32 %v1037_v8, %v1028_v44  ;;  %v1054_v24 = vadd.f32 %v1041_v49, %v1030_v45  ;;  %v2771_v25 = vadd.f32 %v1049_v32, %v1034_v47  ;;  %v2773_v26 = vadd.f32 %v1045_v33, %v1032_v48 }
 0x497   : > { %v1067_v27 = vmul.f32 0.044715, %v1051_v50  ;;  %v1069_v30 = vmul.f32 0.044715, %v1053_v51  ;;  %v1073_v36 = vmul.f32 0.044715, %v2767_v18 }
 0x498   : > { %v1068_v38 = vmul.f32 0.044715, %v1052_v23  ;;  %v1070_v54 = vmul.f32 0.044715, %v1054_v24  ;;  %v1074_v56 = vmul.f32 0.044715, %v2771_v25 }
 0x499   : > { %v1075_v7 = vmul.f32 %v1067_v27, %v1051_v50  ;;  %v1077_v58 = vmul.f32 %v1069_v30, %v1053_v51  ;;  %v1081_v9 = vmul.f32 %v1073_v36, %v2767_v18  ;;  %v1071_v59 = vmul.f32 0.044715, %v2769_v22 }
 0x49a   : > { %v1076_v6 = vmul.f32 %v1068_v38, %v1052_v23  ;;  %v1072_v60 = vmul.f32 0.044715, %v2773_v26  ;;  %v1078_v43 = vmul.f32 %v1070_v54, %v1054_v24  ;;  %v1082_v0 = vmul.f32 %v1074_v56, %v2771_v25 }
 0x49b   : > { %v1083_v12 = vmul.f32 %v1075_v7, %v1051_v50  ;;  %v1085_v8 = vmul.f32 %v1077_v58, %v1053_v51  ;;  %v1089_v62 = vmul.f32 %v1081_v9, %v2767_v18  ;;  %v1079_v63 = vmul.f32 %v1071_v59, %v2769_v22 }
 0x49c   : > { %v1080_v40 = vmul.f32 %v1072_v60, %v2773_v26  ;;  %v1084_v46 = vmul.f32 %v1076_v6, %v1052_v23  ;;  %v1086_v10 = vmul.f32 %v1078_v43, %v1054_v24  ;;  %v1090_v31 = vmul.f32 %v1082_v0, %v2771_v25 }
 0x49d   : > { %v1091_v49 = vadd.f32 %v1083_v12, %v1051_v50  ;;  %v1087_v1 = vmul.f32 %v1079_v63, %v2769_v22  ;;  %v1093_v15 = vadd.f32 %v1085_v8, %v1053_v51  ;;  %v1097_v16 = vadd.f32 %v1089_v62, %v2767_v18 }
 0x49e   : > { %v1092_v13 = vadd.f32 %v1084_v46, %v1052_v23  ;;  %v1094_v20 = vadd.f32 %v1086_v10, %v1054_v24  ;;  %v1088_v29 = vmul.f32 %v1080_v40, %v2773_v26  ;;  %v1098_v35 = vadd.f32 %v1090_v31, %v2771_v25 }
 0x49f   : > { %v1095_v17 = vadd.f32 %v1087_v1, %v2769_v22  ;;  %v1099_v19 = vmul.f32 0.7978846, %v1091_v49  ;;  %v1101_v28 = vmul.f32 0.7978846, %v1093_v15  ;;  %v1105_v42 = vmul.f32 0.7978846, %v1097_v16 }
 0x4a0   : > { %v1100_v21 = vmul.f32 0.7978846, %v1092_v13  ;;  %v1102_v32 = vmul.f32 0.7978846, %v1094_v20  ;;  %v1096_v33 = vadd.f32 %v1088_v29, %v2773_v26  ;;  %v1106_v44 = vmul.f32 0.7978846, %v1098_v35 }
 0x4a1   : > { %1890 = vtanh.f32 %v1099_v19  ;;  %v1103_v34 = vmul.f32 0.7978846, %v1095_v17  ;;  %v1060_v30 = vmul.f32 0.5, %v1052_v23  ;;  %v1059_v54 = vmul.f32 0.5, %v1051_v50  ;;  %v1131_v20 = vld [vmem:[#allocation10] sm:$0xff] }
 0x4a2   : > { %1892 = vtanh.f32 %v1100_v21  ;;  %v1104_v41 = vmul.f32 0.7978846, %v1096_v33  ;;  %v1061_v56 = vmul.f32 0.5, %v1053_v51  ;;  %v1062_v9 = vmul.f32 0.5, %v1054_v24 }
 0x4a3   : > { %1894 = vtanh.f32 %v1101_v28  ;;  %v1064_v43 = vmul.f32 0.5, %v2773_v26  ;;  %v1066_v23 = vmul.f32 0.5, %v2771_v25  ;;  %v1063_v50 = vmul.f32 0.5, %v2769_v22  ;;  %v1132_v22 = vld [vmem:[#allocation10 + $0x8] sm:$0xff]  ;;  %v1134_v25 = vld [vmem:[#allocation10 + $0x18] sm:$0xff]  ;;  %v1137_v28 = vpop.permute.xlu1 %1136 }
 0x4a4   : > { %1896 = vtanh.f32 %v1102_v32  ;;  %v1065_v24 = vmul.f32 0.5, %v2767_v18  ;;  %v1133_v18 = vld [vmem:[#allocation10 + $0x10] sm:$0xff]  ;;  %v2239_v21 = vmov 7  }
 0x4a5   : > { %1898 = vtanh.f32 %v1103_v34  ;;  %1872 = vset.pattern.permute.xlu0 %v2239_v21  ;;  %1873 = vset.pattern.permute.xlu1 %v2239_v21  ;;  %v1141_v34 = vpop.permute.xlu0 %1140 }
 0x4a6   : > { %1900 = vtanh.f32 %v1104_v41  ;;  %1329 = vperm.xlu0 %1872, %v2630_v2   ;;  %1333 = vperm.xlu1 %1873, %v2634_v3  }
 0x4a7   : > { %1902 = vtanh.f32 %v1106_v44  ;;  %v1145_v44 = vpop.permute.xlu1 %1144 }
 0x4a8   : > { %1904 = vtanh.f32 %v1105_v42 }
 0x4aa   : > { %1337 = vperm.xlu1 %1873, %v2638_v4   ;;  %1341 = vperm.xlu0 %1872, %v2640_v5  }
 0x4ab   : > { %v1891_v45 = vpop.eup %1890 }
 0x4ac   : > { %v1893_v47 = vpop.eup %1892  ;;  %v1115_v48 = vadd.f32 1.0, %v1891_v45 }
 0x4ad   : > { %v1895_v27 = vpop.eup %1894  ;;  %v1116_v36 = vadd.f32 1.0, %v1893_v47 }
 0x4ae   : > { %v1897_v38 = vpop.eup %1896  ;;  %v1117_v7 = vadd.f32 1.0, %v1895_v27  ;;  %v1123_v12 = vmul.f32 %v1115_v48, %v1059_v54 }
 0x4af   : > { %v1899_v58 = vpop.eup %1898  ;;  %v1118_v59 = vadd.f32 1.0, %v1897_v38  ;;  %v1124_v6 = vmul.f32 %v1116_v36, %v1060_v30 }
 0x4b0   : > { %v1901_v60 = vpop.eup %1900  ;;  %v1125_v8 = vmul.f32 %v1117_v7, %v1061_v56  ;;  %v1119_v62 = vadd.f32 1.0, %v1899_v58 }
 0x4b1   : > { %v1903_v63 = vpop.eup %1902  ;;  %v1126_v40 = vmul.f32 %v1118_v59, %v1062_v9  ;;  %v1120_v46 = vadd.f32 1.0, %v1901_v60 }
 0x4b2   : > { %v1905_v49 = vpop.eup %1904  ;;  %v1122_v0 = vadd.f32 1.0, %v1903_v63  ;;  %v1713_v13 = vpack.c.bf16 %v1125_v8, %v1123_v12  ;;  %v1127_v16 = vmul.f32 %v1119_v62, %v1063_v50  ;;  %v1149_v62 = vpop.permute.xlu1 %1148 }
 0x4b3   : > { %v1711_v51 = vpack.c.bf16 %v1126_v40, %v1124_v6  ;;  %v1128_v1 = vmul.f32 %v1120_v46, %v1064_v43  ;;  %v1121_v10 = vadd.f32 1.0, %v1905_v49 }
 0x4b4   : > { %v1130_v15 = vmul.f32 %v1122_v0, %v1066_v23 }
 0x4b5   : > { %1712 = vmatprep.subr.bf16.mxu0 %v1711_v51  ;;  %v1129_v17 = vmul.f32 %v1121_v10, %v1065_v24 }
 0x4b6   : > { %1714 = vmatpush1.bf16.msra.mxu0 %v1713_v13  ;;  %v1715_v19 = vpack.c.bf16 %v1130_v15, %v1128_v1 }
 0x4b7   : > { %v1717_v26 = vpack.c.bf16 %v1129_v17, %v1127_v16 }
 0x4b8   : > { %1716 = vmatprep.subr.bf16.mxu0 %v1715_v19 }
 0x4ba   : > { %1718 = vmatpush1.bf16.msra.mxu0 %v1717_v26 }
 0x4bd   : > { %1679 = vmatmul.mubr.msk.f32.vlgmr.msra.gmra.mrb[8].mxu0 %vm607_vm0, %v1131_v20 }
 0x4be   : > { %1233 = vmatprep.mubr.f32.mxu0 %v2233_v11 }
 0x4c1   : > { %1680 = vmatmul.mubr.msk.f32.gmra.mrb[10].mxu0 %vm607_vm0, %v1132_v22 }
 0x4c2   : > { %1239 = vmatprep.mubr.f32.mxu0 %v2233_v11 }
 0x4c5   : > { %1681 = vmatmul.mubr.msk.f32.gmra.mrb[12].mxu0 %vm607_vm0, %v1133_v18 }
 0x4c6   : > { %1245 = vmatprep.mubr.f32.mxu0 %v2233_v11 }
 0x4c9   : > { %1682 = vmatmul.mubr.msk.f32.gmra.mrb[14].mxu0 %vm607_vm0, %v1134_v25 }
 0x590   : > { %v1229_v29 = vpop.f32.mrb[8].mxu0 }
 0x591   : > { %v2806_v31 = vadd.f32 %v1229_v29, %v1137_v28  ;;  %v1231_v32 = vpop.f32.mrb[9].mxu0 }
 0x592   : > { %v2808_v33 = vadd.f32 %v1231_v32, %v1137_v28 }
 0x593   : > { %v1260_v35 = vmul.f32 0.044715, %v2806_v31 }
 0x594   : > { %v1261_v41 = vmul.f32 0.044715, %v2808_v33  ;;  %v1235_v42 = vpop.f32.mrb[10].mxu0 }
 0x595   : > { %v1268_v2 = vmul.f32 %v1260_v35, %v2806_v31  ;;  %v2813_v3 = vadd.f32 %v1235_v42, %v1141_v34  ;;  %v1237_v4 = vpop.f32.mrb[11].mxu0 }
 0x596   : > { %v1269_v5 = vmul.f32 %v1261_v41, %v2808_v33  ;;  %v2816_v45 = vadd.f32 %v1237_v4, %v1141_v34 }
 0x597   : > { %v1276_v47 = vmul.f32 %v1268_v2, %v2806_v31  ;;  %v1262_v48 = vmul.f32 0.044715, %v2813_v3 }
 0x598   : > { %v1277_v27 = vmul.f32 %v1269_v5, %v2808_v33  ;;  %v1263_v30 = vmul.f32 0.044715, %v2816_v45  ;;  %v1241_v36 = vpop.f32.mrb[12].mxu0 }
 0x599   : > { %v1284_v38 = vadd.f32 %v1276_v47, %v2806_v31  ;;  %v1270_v54 = vmul.f32 %v1262_v48, %v2813_v3  ;;  %v2824_v56 = vadd.f32 %v1241_v36, %v1145_v44  ;;  %v1243_v7 = vpop.f32.mrb[13].mxu0  ;;  %v1252_v47 = vmul.f32 0.5, %v2806_v31 }
 0x59a   : > { %v1271_v58 = vmul.f32 %v1263_v30, %v2816_v45  ;;  %v2827_v9 = vadd.f32 %v1243_v7, %v1145_v44  ;;  %v1285_v59 = vadd.f32 %v1277_v27, %v2808_v33  ;;  %v1254_v48 = vmul.f32 0.5, %v2813_v3 }
 0x59b   : > { %v1292_v6 = vmul.f32 0.7978846, %v1284_v38  ;;  %v1278_v60 = vmul.f32 %v1270_v54, %v2813_v3  ;;  %v1264_v12 = vmul.f32 0.044715, %v2824_v56  ;;  %v1253_v30 = vmul.f32 0.5, %v2808_v33 }
 0x59c   : > { %v1279_v8 = vmul.f32 %v1271_v58, %v2816_v45  ;;  %v1265_v63 = vmul.f32 0.044715, %v2827_v9  ;;  %v1247_v40 = vpop.f32.mrb[14].mxu0  ;;  %v1293_v43 = vmul.f32 0.7978846, %v1285_v59  ;;  %v1255_v36 = vmul.f32 0.5, %v2816_v45 }
 0x59d   : > { %1906 = vtanh.f32 %v1292_v6  ;;  %v1286_v46 = vadd.f32 %v1278_v60, %v2813_v3  ;;  %v1272_v49 = vmul.f32 %v1264_v12, %v2824_v56  ;;  %v1248_v23 = vadd.f32 %v1247_v40, %v1149_v62  ;;  %v1249_v0 = vpop.f32.mrb[15].mxu0 }
 0x59e   : > { %v1273_v50 = vmul.f32 %v1265_v63, %v2827_v9  ;;  %v1250_v51 = vadd.f32 %v1249_v0, %v1149_v62  ;;  %v1287_v1 = vadd.f32 %v1279_v8, %v2816_v45  ;;  %1908 = vtanh.f32 %v1293_v43 }
 0x59f   : > { %v1294_v24 = vmul.f32 0.7978846, %v1286_v46  ;;  %v1280_v10 = vmul.f32 %v1272_v49, %v2824_v56  ;;  %v1266_v13 = vmul.f32 0.044715, %v1248_v23  ;;  %v1256_v3 = vmul.f32 0.5, %v2824_v56 }
 0x5a0   : > { %v1281_v15 = vmul.f32 %v1273_v50, %v2827_v9  ;;  %v1267_v16 = vmul.f32 0.044715, %v1250_v51  ;;  %v1295_v17 = vmul.f32 0.7978846, %v1287_v1  ;;  %v1258_v33 = vmul.f32 0.5, %v1248_v23 }
 0x5a1   : > { %1910 = vtanh.f32 %v1294_v24  ;;  %v1288_v19 = vadd.f32 %v1280_v10, %v2824_v56  ;;  %v1274_v26 = vmul.f32 %v1266_v13, %v1248_v23  ;;  %v1257_v45 = vmul.f32 0.5, %v2827_v9  ;;  %v1325_v56 = vld [vmem:[#allocation11 + $0x8] sm:$0xff] }
 0x5a2   : > { %v1275_v20 = vmul.f32 %v1267_v16, %v1250_v51  ;;  %1912 = vtanh.f32 %v1295_v17  ;;  %v1289_v22 = vadd.f32 %v1281_v15, %v2827_v9  ;;  %v1259_v46 = vmul.f32 0.5, %v1250_v51  ;;  %v1324_v15 = vld [vmem:[#allocation11] sm:$0xff]  ;;  %v1326_v9 = vld [vmem:[#allocation11 + $0x10] sm:$0xff]  ;;  %v1334_v17 = vpop.permute.xlu1 %1333 }
 0x5a3   : > { %v1296_v18 = vmul.f32 0.7978846, %v1288_v19  ;;  %v1282_v25 = vmul.f32 %v1274_v26, %v1248_v23 }
 0x5a4   : > { %v1283_v21 = vmul.f32 %v1275_v20, %v1250_v51  ;;  %v1297_v28 = vmul.f32 0.7978846, %v1289_v22 }
 0x5a5   : > { %1914 = vtanh.f32 %v1296_v18  ;;  %v1290_v29 = vadd.f32 %v1282_v25, %v1248_v23  ;;  %v1327_v23 = vld [vmem:[#allocation11 + $0x18] sm:$0xff] }
 0x5a6   : > { %v1291_v32 = vadd.f32 %v1283_v21, %v1250_v51  ;;  %1916 = vtanh.f32 %v1297_v28  ;;  %v1330_v51 = vpop.permute.xlu0 %1329 }
 0x5a7   : > { %v1907_v34 = vpop.eup %1906  ;;  %v1298_v35 = vmul.f32 0.7978846, %v1290_v29  ;;  %v1338_v29 = vpop.permute.xlu1 %1337 }
 0x5a8   : > { %v1909_v41 = vpop.eup %1908  ;;  %v1299_v42 = vmul.f32 0.7978846, %v1291_v32  ;;  %v1308_v2 = vadd.f32 1.0, %v1907_v34 }
 0x5a9   : > { %1918 = vtanh.f32 %v1298_v35  ;;  %v1309_v5 = vadd.f32 1.0, %v1909_v41 }
 0x5aa   : > { %1920 = vtanh.f32 %v1299_v42  ;;  %v1316_v54 = vmul.f32 %v1308_v2, %v1252_v47 }
 0x5ab   : > { %v1911_v4 = vpop.eup %1910  ;;  %v1317_v59 = vmul.f32 %v1309_v5, %v1253_v30 }
 0x5ac   : > { %v1913_v44 = vpop.eup %1912  ;;  %v1310_v27 = vadd.f32 1.0, %v1911_v4  ;;  %v1342_v4 = vpop.permute.xlu0 %1341 }
 0x5ad   : > { %v1311_v38 = vadd.f32 1.0, %v1913_v44 }
 0x5ae   : > { %v1318_v7 = vmul.f32 %v1310_v27, %v1254_v48 }
 0x5af   : > { %v1915_v58 = vpop.eup %1914  ;;  %v1319_v6 = vmul.f32 %v1311_v38, %v1255_v36 }
 0x5b0   : > { %v1917_v60 = vpop.eup %1916  ;;  %v1721_v12 = vpack.c.bf16 %v1318_v7, %v1316_v54  ;;  %v1312_v62 = vadd.f32 1.0, %v1915_v58 }
 0x5b1   : > { %v1719_v8 = vpack.c.bf16 %v1319_v6, %v1317_v59  ;;  %v1313_v31 = vadd.f32 1.0, %v1917_v60 }
 0x5b2   : > { %v1320_v0 = vmul.f32 %v1312_v62, %v1256_v3 }
 0x5b3   : > { %v1919_v63 = vpop.eup %1918  ;;  %1720 = vmatprep.subr.bf16.mxu1 %v1719_v8  ;;  %v1321_v1 = vmul.f32 %v1313_v31, %v1257_v45 }
 0x5b4   : > { %v1921_v40 = vpop.eup %1920  ;;  %1722 = vmatpush1.bf16.msra.mxu1 %v1721_v12  ;;  %v1314_v43 = vadd.f32 1.0, %v1919_v63 }
 0x5b5   : > { %v1315_v49 = vadd.f32 1.0, %v1921_v40 }
 0x5b6   : > { %v1322_v50 = vmul.f32 %v1314_v43, %v1258_v33 }
 0x5b7   : > { %v1323_v24 = vmul.f32 %v1315_v49, %v1259_v46 }
 0x5b8   : > { %v1725_v10 = vpack.c.bf16 %v1322_v50, %v1320_v0 }
 0x5b9   : > { %v1723_v13 = vpack.c.bf16 %v1323_v24, %v1321_v1 }
 0x5bb   : > { %1724 = vmatprep.subr.bf16.mxu1 %v1723_v13 }
 0x5bc   : > { %1726 = vmatpush1.bf16.msra.mxu1 %v1725_v10 }
 0x5bf   : > { %1683 = vmatmul.mubr.msk.f32.vlgmr.msra.gmra.mrb[10].mxu1 %vm607_vm0, %v1324_v15 }
 0x5c0   : > { %1426 = vmatprep.mubr.f32.mxu1 %v2233_v11 }
 0x5c3   : > { %1684 = vmatmul.mubr.msk.f32.gmra.mrb[12].mxu1 %vm607_vm0, %v1325_v56 }
 0x5c4   : > { %1432 = vmatprep.mubr.f32.mxu1 %v2233_v11 }
 0x5c7   : > { %1685 = vmatmul.mubr.msk.f32.gmra.mrb[14].mxu1 %vm607_vm0, %v1326_v9 }
 0x5c8   : > { %1438 = vmatprep.mubr.f32.mxu1 %v2233_v11 }
 0x5cb   : > { %1686 = vmatmul.mubr.msk.f32.gmra.mrb[16].mxu1 %vm607_vm0, %v1327_v23 }
 0x692   : > { %v1422_v16 = vpop.f32.mrb[10].mxu1 }
 0x693   : > { %v1423_v19 = vadd.f32 %v1422_v16, %v1330_v51  ;;  %v1424_v26 = vpop.f32.mrb[11].mxu1 }
 0x694   : > { %v1425_v20 = vadd.f32 %v1424_v26, %v1330_v51 }
 0x695   : > { %v1445_v22 = vadd.f32 %v1423_v19, %v2734_v37 }
 0x696   : > { %v1446_v18 = vadd.f32 %v1425_v20, %v2740_v55  ;;  %v1428_v25 = vpop.f32.mrb[12].mxu1 }
 0x697   : > { %1453 = vst [vmem:[%s2859_s30] sm:$0xff] %v1445_v22  ;;  %v1429_v11 = vadd.f32 %v1428_v25, %v1334_v17  ;;  %v1430_v21 = vpop.f32.mrb[13].mxu1 }
 0x698   : > { %1454 = vst [vmem:[%s2859_s30 + $0x8] sm:$0xff] %v1446_v18  ;;  %v1431_v28 = vadd.f32 %v1430_v21, %v1334_v17 }
 0x699   : > { %v1447_v37 = vadd.f32 %v1429_v11, %v2728_v52 }
 0x69a   : > { %v1448_v55 = vadd.f32 %v1431_v28, %v2731_v53  ;;  %v1434_v32 = vpop.f32.mrb[14].mxu1 }
 0x69b   : > { %1455 = vst [vmem:[%s2859_s30 + $0x10] sm:$0xff] %v1447_v37  ;;  %v1435_v34 = vadd.f32 %v1434_v32, %v1338_v29  ;;  %v1436_v35 = vpop.f32.mrb[15].mxu1 }
 0x69c   : > { %1456 = vst [vmem:[%s2859_s30 + $0x18] sm:$0xff] %v1448_v55  ;;  %v1437_v41 = vadd.f32 %v1436_v35, %v1338_v29 }
 0x69d   : > { %v1449_v42 = vadd.f32 %v1435_v34, %v2737_v39 }
 0x69e   : > { %v1450_v2 = vadd.f32 %v1437_v41, %v2743_v57  ;;  %v1440_v5 = vpop.f32.mrb[16].mxu1 }
 0x69f   : > { %1457 = vst [vmem:[%s2859_s30 + $0x20] sm:$0xff] %v1449_v42  ;;  %v1441_v52 = vadd.f32 %v1440_v5, %v1342_v4  ;;  %v1442_v53 = vpop.f32.mrb[17].mxu1 }
 0x6a0   : > { %1458 = vst [vmem:[%s2859_s30 + $0x28] sm:$0xff] %v1450_v2  ;;  %v1443_v44 = vadd.f32 %v1442_v53, %v1342_v4 }
 0x6a1   : > { %v1451_v47 = vadd.f32 %v1441_v52, %v2751_v61 }
 0x6a2   : > { %v1452_v39 = vadd.f32 %v1443_v44, %v2755_v14 }
 0x6a3   : > { %1459 = vst [vmem:[%s2859_s30 + $0x30] sm:$0xff] %v1451_v47 }
 0x6a4   : > { %1460 = vst [vmem:[%s2859_s30 + $0x38] sm:$0xff] %v1452_v39 }
 0x6a5   : > { %2137 = shalt.err (!%p2134_p12)
}
 0x6a6   : > { %s2138_s24 = scalar_lea.hbm %s2879_s23, 1024  ;;  %s2142_s9 = scalar_lea.hbm %s2938_s7, 2048 }
 0x6a7   : > { %p2139_p0 = scmp.ne.s32.totalorder %s2879_s23, %s2138_s24  ;;  %p2143_p2 = scmp.lt.u32.totalorder %s2879_s23, %s2938_s7 }
 0x6a8   : > { %p2144_p7 = scmp.lt.u32.totalorder %s2142_s9, %s2138_s24  ;;  %p2146_p8 = scmp.lt.u32.totalorder %s2138_s24, %s2879_s23 }
 0x6a9   : > { %p2140_p4 = pnand %p2139_p0, %p2992_p6 }
 0x6aa   : > { %p2145_p10 = por %p2144_p7, %p2143_p2 }
 0x6ab   : > { %p2141_p1 = pneg %p2140_p4 }
 0x6ac   : > { %p2147_p3 = por %p2146_p8, %p2145_p10 }
 0x6ae   : > { %p2148_p9 = pnand %p2147_p3, %p2141_p1 }
 0x6b0   : > { %2151 = shalt.err (!%p2148_p9)
}
 0x6b1   : > { %s2241_s22 = smov 256   ;;  %s2242_s1 = smov 16  }
 0x6b2   : > { %1749 = dma.vmem_to_hbm [thread:$0]  (%p2992_p6), %s2872_s20, 1024, %s2879_s23, %s1462_s27, %s2241_s22, %s2241_s22, %s2242_s1  }
 0x6b3 PF: > { %s2993_s26 = sld [smem:[#allocation20_spill]]  ;;  %s2994_s17 = sld [smem:[#allocation25_spill]] }
 0x6b4   : > { %s2995_s15 = sld [smem:[#allocation22_spill]] }
 0x6b9   : > { %s1492_s30 = sand.u32 1, %s2993_s26   ;;  %p2996_p5 = scmp.ne.s32.totalorder %s2994_s17, 0 }
 0x6ba   : > { %p2997_p11 = scmp.ge.s32.totalorder %s2995_s15, 2  ;;  %s1493_s11 = scalar_lea.sflag [#allocation4], %s1492_s30 }
 0x6bc   : > { %p1775_p13 = pnand %p2997_p11, %p2996_p5 }
 0x6be   : > { %2193 = dma.done.wait (!%p1775_p13), %s1493_s11, 1024  }
 0x6bf   : > { %2195 = vsyncadd (!%p1775_p13), %s1493_s11, 4294966272  ;;  %s28_s29 = sadd.s32 1, %s2995_s15   ;;  %s2998_s14 = sld [smem:[#allocation21_spill]] }
 0x6c0   : > { %p25_p12 = scmp.ge.s32.totalorder %s28_s29, 4   ;;  %s2999_s26 = sld [smem:[#allocation24_spill]] }
 0x6c1   : > { %s3000_s21 = sld [smem:[#allocation23_spill]]  ;;  %s3001_s24 = smov %s2202_s25 }
 0x6c2   : > { %s3003_s27 = smov %s2214_s28  ;;  %27 = sbr.rel (!%p25_p12) target bundleno = 14 (0xe), region = 133 }
 0x6c5   : > { %s3002_s25 = smov %s2998_s14 }
 0x6c7   : > { %s3004_s28 = smov %s3000_s21 }
 0x6c9   :  { %1498 = vsyncpa [#allocation3], 1 }
 0x6ca   :  { %1500 = vsyncpa [#allocation3 + $0x1], 1 }
 0x6cb   :  { %1501 = vsyncpa [#allocation6], 1 }
 0x6cc   :  { %1503 = vsyncpa [#allocation6 + $0x1], 1 }
 0x6cd   :  { %1504 = vsyncpa [#allocation9], 1 }
 0x6ce   :  { %1505 = vsyncpa [#allocation12], 1 }
 0x6cf   :  { %1506 = vsyncpa [#allocation4], 1 }
 0x6d0   :  { %1508 = vsyncpa [#allocation4 + $0x1], 1 }

</bundles_post_ra>
